<compile_context>
chip_gen: v7x
topology: tpu7x:2x2x1
jax: 0.10.0
libtpu: 0.0.40
codegen_flags: <defaults>
</compile_context>

<pallas_src>
import functools

import numpy as np

import jax
import jax.numpy as jnp
from jax.experimental import pallas as pl
from jax.experimental.pallas import tpu as pltpu


_VMEM = pl.BlockSpec(memory_space=pltpu.MemorySpace.VMEM)

# Conservative per-step VMEM budget used for tile selection (leaves headroom
# for double buffering + compiler scratch on every generation, incl. v7x's
# 64 MiB part and v5e's 16 MiB default scoped limit once raised).
_VMEM_TILE_BUDGET = 20 * (1 << 20)
_MAX_FREE_COLS = 4096      # GEMM free dim beyond this buys nothing here
_MIN_FREE_COLS = 512       # target free dim when batching images per step


# -----------------------------------------------------------------------------
# Kernel 1: fused conv(3x3, pad=1) + bias + ReLU + adaptive-avg-pool
# -----------------------------------------------------------------------------
def _conv_pool_kernel(x_ref, w_ref, b_ref, pm_ref, out_ref, pool_ref):
    """One (batch-tile, row-tile) grid step.

    x_ref:    (Bt, Cin, H+2, W+2)  f32  zero-padded NCHW batch tile
                                        (resident across the row-tile axis)
    w_ref:    (Cout, 9*Cin)        f32  conv weights, tap-major columns
    b_ref:    (Cout, 1)            f32  bias
    pm_ref:   (TH*W, P_loc)        f32  local adaptive-pool weights
    out_ref:  (Bt, Cout, TH*W)     f32  conv activation (NCHW-flattened)
    pool_ref: (Bt, Cout, P_loc)    f32  pooled averages for this row tile
    """
    bt = x_ref.shape[0]
    cin = x_ref.shape[1]
    w_img = x_ref.shape[3] - 2
    thw = out_ref.shape[2]
    th = thw // w_img
    r = pl.program_id(1)

    # Channel-major im2col patch matrix: rows = (tap, cin), lanes = spatial.
    per_image = []
    for i in range(bt):
        if x_ref.shape[2] == th + 2:
            xi = x_ref[i]                                   # no row tiling
        else:
            # row tile r of the VMEM-resident padded image (2-row halo)
            xi = x_ref[i, :, pl.ds(r * th, th + 2), :]
        taps = []
        for dy in range(3):
            for dx in range(3):
                taps.append(
                    xi[:, dy:dy + th, dx:dx + w_img].reshape(cin, thw))
        per_image.append(jnp.concatenate(taps, axis=0))     # (9*Cin, TH*W)
    patches = per_image[0] if bt == 1 else jnp.concatenate(per_image, axis=1)

    # One MXU GEMM; result is natively (Cout, Bt*TH*W): lane-dense, matches
    # the NCHW flatten order, no transpose needed afterwards.
    acc = jnp.dot(w_ref[...], patches, preferred_element_type=jnp.float32)
    acc = jnp.maximum(acc + b_ref[...], 0.0)                # (Cout, Bt*TH*W)

    pm = pm_ref[...]
    for i in range(bt):
        oi = acc[:, i * thw:(i + 1) * thw]                  # cheap lane slice
        out_ref[i] = oi.astype(out_ref.dtype)
        # Fused adaptive average pooling while the tile is resident in VMEM.
        pool_ref[i] = jnp.dot(oi, pm, preferred_element_type=jnp.float32)


# -----------------------------------------------------------------------------
# Kernel 2: LLS head (L2 normalize -> basis matmul -> label-smoothed CE)
# -----------------------------------------------------------------------------
def _lls_head_kernel(lat_ref, basis_ref, tgt_ref, logits_ref, loss_ref, *,
                     temperature, n_valid):
    lat = lat_ref[...]                                      # (B, feat) f32
    # F.normalize(dim=1): x / max(||x||_2, 1e-12)
    norm = jnp.sqrt(jnp.sum(lat * lat, axis=-1, keepdims=True))
    lat = lat / jnp.maximum(norm, 1e-12)

    # layer_pred = latents @ basis.T  (basis padded to 128 lanes with zeros)
    logits = jnp.dot(lat, basis_ref[...],
                     preferred_element_type=jnp.float32)    # (B, Kp)
    logits_ref[...] = logits

    col = jax.lax.broadcasted_iota(jnp.int32, logits.shape, 1)
    valid = col < n_valid

    # cross_entropy(logits / T, labels, label_smoothing) with reduction='mean'
    lt = jnp.where(valid, logits * (1.0 / temperature), jnp.float32(-1e30))
    m = jnp.max(lt, axis=-1, keepdims=True)
    p = jnp.where(valid, jnp.exp(lt - m), 0.0)
    lse = jnp.log(jnp.sum(p, axis=-1, keepdims=True)) + m
    logp = lt - lse
    ce = -jnp.sum(jnp.where(valid, tgt_ref[...] * logp, 0.0),
                  axis=-1, keepdims=True)                   # (B, 1)
    loss_ref[...] = jnp.sum(ce, axis=0, keepdims=True) * (1.0 / lat.shape[0])


# -----------------------------------------------------------------------------
# Trace-time (numpy) constants
# -----------------------------------------------------------------------------
def _round_up(x, m):
    return ((x + m - 1) // m) * m


def _frequency_basis_np(num_rows, num_cols, min_freq=50.0, max_freq=2000.0,
                        waveform='cosine'):
    """Matches torch generate_frequency_matrix: sin(f_i * t_j),
    f = linspace(min,max,num_rows), t = arange(num_cols).  The torch code
    always uses sin regardless of the 'cosine' label; 'square' applies sign.
    compute_LLS calls it with max_freq=512."""
    freqs = np.linspace(min_freq, max_freq, num_rows).astype(np.float32)[:, None]
    t = np.arange(num_cols, dtype=np.float32)[None, :]
    basis = np.sin(freqs * t).astype(np.float32)
    if waveform == 'square':
        basis = np.sign(basis).astype(np.float32)
    return basis                                            # (K, feat)


def _adaptive_pool_weights_np(n_in, n_out):
    """(n_in, n_out) matrix of torch-style adaptive-avg-pool 1D weights."""
    p = np.arange(n_out)
    starts = (p * n_in) // n_out
    ends = -((-(p + 1) * n_in) // n_out)                    # ceil((p+1)*n_in/n_out)
    idx = np.arange(n_in)
    mask = (idx[:, None] >= starts[None, :]) & (idx[:, None] < ends[None, :])
    return mask.astype(np.float32) / (ends - starts).astype(np.float32)[None, :]


def _adaptive_pool_matrix_np(H, W, act):
    """(H*W, act*act) matrix: flat spatial -> pooled cells (torch semantics)."""
    mh = _adaptive_pool_weights_np(H, act)                  # (H, act)
    mw = _adaptive_pool_weights_np(W, act)                  # (W, act)
    pm = mh[:, None, :, None] * mw[None, :, None, :]        # (H, W, act, act)
    return pm.reshape(H * W, act * act).astype(np.float32)


# -----------------------------------------------------------------------------
# VMEM-aware tile / batch-block selection
# -----------------------------------------------------------------------------
def _conv_vmem_bytes(bt, th, H, W, cin, cout, p_loc):
    """Rough per-step VMEM estimate: double-buffered pipeline blocks plus
    in-kernel temporaries (patches + GEMM accumulator), in bytes."""
    thw = th * W
    x_blk = bt * cin * (H + 2) * (W + 2) * 4
    out_blk = bt * cout * thw * 4
    pool_blk = bt * cout * p_loc * 4
    patches = 9 * cin * bt * thw * 4
    acc = cout * bt * thw * 4
    pm = thw * p_loc * 4
    wgt = cout * 9 * cin * 4 + cout * 4
    return 2 * (x_blk + out_blk + pool_blk + pm + wgt) + patches + acc + (1 << 16)


def _choose_tiles(B, H, W, act, cin, cout):
    """Pick (row-tile TH, n_rt, local pool width, images-per-step Bt)."""
    # Row tiling is only needed when a full image exceeds the VMEM budget and
    # the adaptive-pool row windows align (H % act == 0).
    th = H
    if (_conv_vmem_bytes(1, H, H, W, cin, cout, act * act) > _VMEM_TILE_BUDGET
            and H % act == 0):
        kh = H // act
        cands = [t for t in range(kh, H + 1, kh)
                 if H % t == 0 and (t * W) % 128 == 0]
        fitting = [t for t in cands
                   if _conv_vmem_bytes(1, t, H, W, cin, cout,
                                       (t // kh) * act) <= _VMEM_TILE_BUDGET]
        if fitting:
            th = max(fitting)
        elif cands:
            th = min(cands)
    # TODO(synk): when H % act != 0 and the image is too large for VMEM, a
    # general-window row tiling (overlapping pooled accumulation) is needed.
    n_rt = H // th
    p_loc = act * act if n_rt == 1 else (th // (H // act)) * act

    # Batch blocking: grow the GEMM free dimension while staying under the
    # VMEM budget and keeping >=2 grid steps for v7x megacore sharding.
    bt = 1
    for cand in range(2, B + 1):
        if B % cand:
            continue
        if bt * th * W >= _MIN_FREE_COLS:
            break
        if cand * th * W > _MAX_FREE_COLS:
            break
        if _conv_vmem_bytes(cand, th, H, W, cin, cout, p_loc) > _VMEM_TILE_BUDGET:
            break
        if (B // cand) * n_rt < 2 and B * n_rt >= 2:
            break
        bt = cand
    return th, n_rt, p_loc, bt


# -----------------------------------------------------------------------------
# Forward (jitted; all static config bound via functools.partial)
# -----------------------------------------------------------------------------
def lls_forward(x_nchw, labels, weight, bias, *, n_classes, temperature,
                label_smoothing, pooling_size, waveform):
    B, Cin, H, W = x_nchw.shape
    Cout = weight.shape[0]
    act = pooling_size
    feat = Cout * act * act
    HW = H * W

    # ---- trace-time constants ----
    pm_full = _adaptive_pool_matrix_np(H, W, act)              # (H*W, act*act)
    basis = _frequency_basis_np(n_classes, feat, max_freq=512.0,
                                waveform=waveform)             # (K, feat)
    Kp = _round_up(max(n_classes, 1), 128)
    basis_t_pad = np.zeros((feat, Kp), np.float32)
    basis_t_pad[:, :n_classes] = basis.T

    TH, n_rt, p_loc, Bt = _choose_tiles(B, H, W, act, Cin, Cout)
    pm_local = pm_full if n_rt == 1 else pm_full[:TH * W, :p_loc]

    vmem_est = _conv_vmem_bytes(Bt, TH, H, W, Cin, Cout, p_loc)
    vmem_limit = int(min(56 * (1 << 20), max(2 * vmem_est, 24 * (1 << 20))))

    # ---- layout prep (kept in NCHW; no activation-sized transposes) ----
    x_pad = jnp.pad(x_nchw.astype(jnp.float32),
                    ((0, 0), (0, 0), (1, 1), (1, 1)))          # (B,Cin,H+2,W+2)
    # weight (Cout, Cin, 3, 3) -> (Cout, 9*Cin), tap-major columns
    w_mat = jnp.transpose(weight, (0, 2, 3, 1)).reshape(Cout, 9 * Cin)
    w_mat = w_mat.astype(jnp.float32)
    bias_col = bias.astype(jnp.float32).reshape(Cout, 1)

    n_bt = B // Bt
    grid = (n_bt, n_rt)

    in_specs = [
        # padded input: constant index along r -> fetched once per batch tile,
        # stays resident in VMEM across row tiles (no halo gather in HBM).
        pl.BlockSpec((Bt, Cin, H + 2, W + 2), lambda b, r: (b, 0, 0, 0)),
        pl.BlockSpec((Cout, 9 * Cin), lambda b, r: (0, 0)),
        pl.BlockSpec((Cout, 1), lambda b, r: (0, 0)),
        pl.BlockSpec((TH * W, p_loc), lambda b, r: (0, 0)),
    ]
    conv_out_spec = pl.BlockSpec((Bt, Cout, TH * W), lambda b, r: (b, 0, r))

    if n_rt == 1:
        # pooled output lands directly in its final (B, Cout, act*act) layout.
        pool_shape = jax.ShapeDtypeStruct((B, Cout, act * act), jnp.float32)
        pool_spec = pl.BlockSpec((Bt, Cout, act * act), lambda b, r: (b, 0, 0))
    else:
        # per-row-tile pooled chunks; reassembled by a tiny wrapper transpose.
        pool_shape = jax.ShapeDtypeStruct((B, n_rt, Cout, p_loc), jnp.float32)
        pool_spec = pl.BlockSpec((Bt, None, Cout, p_loc),
                                 lambda b, r: (b, r, 0, 0))

    conv_flat, pooled = pl.pallas_call(
        _conv_pool_kernel,
        out_shape=(jax.ShapeDtypeStruct((B, Cout, HW), jnp.float32),
                   pool_shape),
        grid=grid,
        in_specs=in_specs,
        out_specs=(conv_out_spec, pool_spec),
        compiler_params=pltpu.CompilerParams(
            dimension_semantics=("parallel", "parallel"),
            vmem_limit_bytes=vmem_limit),
    )(x_pad, w_mat, bias_col, jnp.asarray(pm_local))

    out_nchw = conv_flat.reshape(B, Cout, H, W)
    if n_rt == 1:
        latents = pooled.reshape(B, feat)                      # torch .view(B,-1)
    else:
        # pooled tensor is tiny (B x feat f32); this transpose is negligible.
        latents = pooled.transpose(0, 2, 1, 3).reshape(B, feat)

    # ---- LLS head (launch-bound; single tiny call) ----
    onehot = jax.nn.one_hot(labels, n_classes, dtype=jnp.float32)
    target = (1.0 - label_smoothing) * onehot + label_smoothing / n_classes
    target_p = jnp.pad(target, ((0, 0), (0, Kp - n_classes)))

    logits_p, loss = pl.pallas_call(
        functools.partial(_lls_head_kernel,
                          temperature=float(temperature),
                          n_valid=n_classes),
        out_shape=(jax.ShapeDtypeStruct((B, Kp), jnp.float32),
                   jax.ShapeDtypeStruct((1, 1), jnp.float32)),
        in_specs=[_VMEM, _VMEM, _VMEM],
        out_specs=(_VMEM, _VMEM),
    )(latents, jnp.asarray(basis_t_pad), target_p)

    return out_nchw, logits_p[:, :n_classes], loss[0, 0]


# -----------------------------------------------------------------------------
# LLS_layer equivalent (training_mode='LLS', block = Conv2d(3x3, pad=1)+ReLU)
# -----------------------------------------------------------------------------
class LLSLayerPallas:
    def __init__(self, key, in_channels=4, out_channels=8, n_classes=10,
                 temperature=1.0, label_smoothing=0.0, pooling_size=4,
                 waveform='cosine'):
        kw, kb = jax.random.split(key)
        fan_in = in_channels * 9
        self.weight = (jax.random.normal(
            kw, (out_channels, in_channels, 3, 3), jnp.float32)
            / np.sqrt(fan_in).astype(np.float32))
        self.bias = 0.01 * jax.random.normal(kb, (out_channels,), jnp.float32)
        self._fwd = jax.jit(functools.partial(
            lls_forward,
            n_classes=n_classes,
            temperature=float(temperature),
            label_smoothing=float(label_smoothing),
            pooling_size=pooling_size,
            waveform=waveform))

    def forward(self, x_nchw, labels):
        # TODO(synk): PyTorch runs optimizer.zero_grad()/backward()/step() and
        # loss-statistics recording here; that in-place parameter update is
        # not reproduced.
        return self._fwd(x_nchw, labels, self.weight, self.bias)


# -----------------------------------------------------------------------------
if __name__ == "__main__":
    key = jax.random.PRNGKey(0)
    kx, kl, kp = jax.random.split(key, 3)

    B, Cin, H, W = 2, 4, 16, 16
    n_classes = 10
    x = jax.random.normal(kx, (B, Cin, H, W), jnp.float32)
    labels = jax.random.randint(kl, (B,), 0, n_classes)

    layer = LLSLayerPallas(kp, in_channels=Cin, out_channels=8,
                           n_classes=n_classes, pooling_size=4)

    out, logits, loss = layer.forward(x, labels)
    jax.block_until_ready((out, logits, loss))

    assert out.shape == (B, 8, H, W)
    assert logits.shape == (B, n_classes)
    assert bool(jnp.isfinite(loss))
    print("KERNEL_OK")
</pallas_src>

<mosaic_0001>
module attributes {stable_mosaic.version = 11 : i64} {
  func.func @_conv_pool_kernel(%arg0: i32, %arg1: i32, %arg2: memref<1x4x18x18xf32, #tpu.memory_space<vmem>>, %arg3: memref<8x36xf32, #tpu.memory_space<vmem>>, %arg4: memref<8x1xf32, #tpu.memory_space<vmem>>, %arg5: memref<256x16xf32, #tpu.memory_space<vmem>>, %arg6: memref<1x8x256xf32, #tpu.memory_space<vmem>>, %arg7: memref<1x8x16xf32, #tpu.memory_space<vmem>>) attributes {dimension_semantics = [#tpu.dimension_semantics<parallel>, #tpu.dimension_semantics<parallel>], iteration_bounds = array<i64: 2, 1>, scalar_prefetch = 0 : i64, scratch_operands = 0 : i64, tpu.core_type = #tpu.core_type<tc>, window_params = [{transform_indices = @transform_0, window_bounds = array<i64: 1, 4, 18, 18>}, {pipeline_mode = #tpu.pipeline_mode<synchronous>, transform_indices = @transform_1, window_bounds = array<i64: 8, 36>}, {pipeline_mode = #tpu.pipeline_mode<synchronous>, transform_indices = @transform_2, window_bounds = array<i64: 8, 1>}, {pipeline_mode = #tpu.pipeline_mode<synchronous>, transform_indices = @transform_3, window_bounds = array<i64: 256, 16>}, {transform_indices = @transform_4, window_bounds = array<i64: 1, 8, 256>}, {transform_indices = @transform_5, window_bounds = array<i64: 1, 8, 16>}]} {
    %c0 = arith.constant 0 : index
    %c0_0 = arith.constant 0 : index
    %c0_1 = arith.constant 0 : index
    %c0_2 = arith.constant 0 : index
    %0 = vector.load %arg2[%c0, %c0_0, %c0_1, %c0_2] : memref<1x4x18x18xf32, #tpu.memory_space<vmem>>, vector<1x4x18x18xf32>
    %1 = vector.shape_cast %0 : vector<1x4x18x18xf32> to vector<4x18x18xf32>
    %2 = vector.extract_strided_slice %1 {offsets = [0, 0, 0], sizes = [4, 16, 16], strides = [1, 1, 1]} : vector<4x18x18xf32> to vector<4x16x16xf32>
    %3 = vector.shape_cast %2 : vector<4x16x16xf32> to vector<4x256xf32>
    %4 = vector.extract_strided_slice %1 {offsets = [0, 0, 1], sizes = [4, 16, 16], strides = [1, 1, 1]} : vector<4x18x18xf32> to vector<4x16x16xf32>
    %5 = vector.shape_cast %4 : vector<4x16x16xf32> to vector<4x256xf32>
    %6 = vector.extract_strided_slice %1 {offsets = [0, 0, 2], sizes = [4, 16, 16], strides = [1, 1, 1]} : vector<4x18x18xf32> to vector<4x16x16xf32>
    %7 = vector.shape_cast %6 : vector<4x16x16xf32> to vector<4x256xf32>
    %8 = vector.extract_strided_slice %1 {offsets = [0, 1, 0], sizes = [4, 16, 16], strides = [1, 1, 1]} : vector<4x18x18xf32> to vector<4x16x16xf32>
    %9 = vector.shape_cast %8 : vector<4x16x16xf32> to vector<4x256xf32>
    %10 = vector.extract_strided_slice %1 {offsets = [0, 1, 1], sizes = [4, 16, 16], strides = [1, 1, 1]} : vector<4x18x18xf32> to vector<4x16x16xf32>
    %11 = vector.shape_cast %10 : vector<4x16x16xf32> to vector<4x256xf32>
    %12 = vector.extract_strided_slice %1 {offsets = [0, 1, 2], sizes = [4, 16, 16], strides = [1, 1, 1]} : vector<4x18x18xf32> to vector<4x16x16xf32>
    %13 = vector.shape_cast %12 : vector<4x16x16xf32> to vector<4x256xf32>
    %14 = vector.extract_strided_slice %1 {offsets = [0, 2, 0], sizes = [4, 16, 16], strides = [1, 1, 1]} : vector<4x18x18xf32> to vector<4x16x16xf32>
    %15 = vector.shape_cast %14 : vector<4x16x16xf32> to vector<4x256xf32>
    %16 = vector.extract_strided_slice %1 {offsets = [0, 2, 1], sizes = [4, 16, 16], strides = [1, 1, 1]} : vector<4x18x18xf32> to vector<4x16x16xf32>
    %17 = vector.shape_cast %16 : vector<4x16x16xf32> to vector<4x256xf32>
    %18 = vector.extract_strided_slice %1 {offsets = [0, 2, 2], sizes = [4, 16, 16], strides = [1, 1, 1]} : vector<4x18x18xf32> to vector<4x16x16xf32>
    %19 = vector.shape_cast %18 : vector<4x16x16xf32> to vector<4x256xf32>
    %20 = tpu.concatenate %3, %5, %7, %9, %11, %13, %15, %17, %19 in 0 : vector<4x256xf32>, vector<4x256xf32>, vector<4x256xf32>, vector<4x256xf32>, vector<4x256xf32>, vector<4x256xf32>, vector<4x256xf32>, vector<4x256xf32>, vector<4x256xf32> -> vector<36x256xf32>
    %c0_3 = arith.constant 0 : index
    %c0_4 = arith.constant 0 : index
    %21 = vector.load %arg3[%c0_3, %c0_4] : memref<8x36xf32, #tpu.memory_space<vmem>>, vector<8x36xf32>
    %cst = arith.constant dense<0.000000e+00> : vector<8x256xf32>
    %22 = tpu.matmul %21, %20, %cst {dimension_numbers = #tpu.dot_dimension_numbers<[1], [0], [0], [1], [0, 0, 1, 1], [], []>} : vector<8x36xf32>, vector<36x256xf32>, vector<8x256xf32> -> vector<8x256xf32>
    %c0_5 = arith.constant 0 : index
    %c0_6 = arith.constant 0 : index
    %23 = vector.load %arg4[%c0_5, %c0_6] : memref<8x1xf32, #tpu.memory_space<vmem>>, vector<8x1xf32>
    %24 = vector.broadcast %23 : vector<8x1xf32> to vector<8x256xf32>
    %25 = arith.addf %22, %24 : vector<8x256xf32>
    %cst_7 = arith.constant 0.000000e+00 : f32
    %26 = vector.broadcast %cst_7 : f32 to vector<8x256xf32>
    %27 = arith.maximumf %25, %26 : vector<8x256xf32>
    %c0_8 = arith.constant 0 : index
    %c0_9 = arith.constant 0 : index
    %28 = vector.load %arg5[%c0_8, %c0_9] : memref<256x16xf32, #tpu.memory_space<vmem>>, vector<256x16xf32>
    %c0_10 = arith.constant 0 : index
    %c0_11 = arith.constant 0 : index
    %c0_12 = arith.constant 0 : index
    %29 = vector.load %arg6[%c0_10, %c0_11, %c0_12] : memref<1x8x256xf32, #tpu.memory_space<vmem>>, vector<1x8x256xf32>
    %30 = vector.shape_cast %29 : vector<1x8x256xf32> to vector<8x256xf32>
    %31 = vector.shape_cast %27 : vector<8x256xf32> to vector<1x8x256xf32>
    tpu.vector_store %arg6[%c0_10, %c0_11, %c0_12], %31 {strides = array<i32>} : memref<1x8x256xf32, #tpu.memory_space<vmem>>, vector<1x8x256xf32>,
    %cst_13 = arith.constant dense<0.000000e+00> : vector<8x16xf32>
    %32 = tpu.matmul %27, %28, %cst_13 {dimension_numbers = #tpu.dot_dimension_numbers<[1], [0], [0], [1], [0, 0, 1, 1], [], []>} : vector<8x256xf32>, vector<256x16xf32>, vector<8x16xf32> -> vector<8x16xf32>
    %c0_14 = arith.constant 0 : index
    %c0_15 = arith.constant 0 : index
    %c0_16 = arith.constant 0 : index
    %33 = vector.load %arg7[%c0_14, %c0_15, %c0_16] : memref<1x8x16xf32, #tpu.memory_space<vmem>>, vector<1x8x16xf32>
    %34 = vector.shape_cast %33 : vector<1x8x16xf32> to vector<8x16xf32>
    %35 = vector.shape_cast %32 : vector<8x16xf32> to vector<1x8x16xf32>
    tpu.vector_store %arg7[%c0_14, %c0_15, %c0_16], %35 {strides = array<i32>} : memref<1x8x16xf32, #tpu.memory_space<vmem>>, vector<1x8x16xf32>,
    return
  }
  func.func @transform_0(%arg0: i32, %arg1: i32) -> (i32, i32, i32, i32) {
    %c0_i32 = arith.constant 0 : i32
    %c0_i32_0 = arith.constant 0 : i32
    %c0_i32_1 = arith.constant 0 : i32
    %c0_i32_2 = arith.constant 0 : i32
    return %arg0, %c0_i32, %c0_i32_0, %c0_i32_1 : i32, i32, i32, i32
  }
  func.func @transform_1(%arg0: i32, %arg1: i32) -> (i32, i32) {
    %c0_i32 = arith.constant 0 : i32
    %c0_i32_0 = arith.constant 0 : i32
    %c0_i32_1 = arith.constant 0 : i32
    return %c0_i32, %c0_i32_0 : i32, i32
  }
  func.func @transform_2(%arg0: i32, %arg1: i32) -> (i32, i32) {
    %c0_i32 = arith.constant 0 : i32
    %c0_i32_0 = arith.constant 0 : i32
    %c0_i32_1 = arith.constant 0 : i32
    return %c0_i32, %c0_i32_0 : i32, i32
  }
  func.func @transform_3(%arg0: i32, %arg1: i32) -> (i32, i32) {
    %c0_i32 = arith.constant 0 : i32
    %c0_i32_0 = arith.constant 0 : i32
    %c0_i32_1 = arith.constant 0 : i32
    return %c0_i32, %c0_i32_0 : i32, i32
  }
  func.func @transform_4(%arg0: i32, %arg1: i32) -> (i32, i32, i32) {
    %c0_i32 = arith.constant 0 : i32
    %c0_i32_0 = arith.constant 0 : i32
    return %arg0, %c0_i32, %arg1 : i32, i32, i32
  }
  func.func @transform_5(%arg0: i32, %arg1: i32) -> (i32, i32, i32) {
    %c0_i32 = arith.constant 0 : i32
    %c0_i32_0 = arith.constant 0 : i32
    %c0_i32_1 = arith.constant 0 : i32
    return %arg0, %c0_i32, %c0_i32_0 : i32, i32, i32
  }
}

module attributes {stable_mosaic.version = 11 : i64} {
  func.func @_lls_head_kernel(%arg0: memref<2x128xf32, #tpu.memory_space<vmem>>, %arg1: memref<128x128xf32, #tpu.memory_space<vmem>>, %arg2: memref<2x128xf32, #tpu.memory_space<vmem>>, %arg3: memref<2x128xf32, #tpu.memory_space<vmem>>, %arg4: memref<1x1xf32, #tpu.memory_space<vmem>>) attributes {dimension_semantics = [], scalar_prefetch = 0 : i64, scratch_operands = 0 : i64, tpu.core_type = #tpu.core_type<tc>} {
    %c0 = arith.constant 0 : index
    %c0_0 = arith.constant 0 : index
    %0 = vector.load %arg0[%c0, %c0_0] : memref<2x128xf32, #tpu.memory_space<vmem>>, vector<2x128xf32>
    %1 = arith.mulf %0, %0 : vector<2x128xf32>
    %cst = arith.constant dense<0.000000e+00> : vector<2xf32>
    %2 = vector.multi_reduction <add>, %1, %cst [1] : vector<2x128xf32> to vector<2xf32>
    %3 = vector.shape_cast %2 : vector<2xf32> to vector<2x1xf32>
    %4 = math.sqrt %3 : vector<2x1xf32>
    %cst_1 = arith.constant 9.99999996E-13 : f32
    %5 = vector.broadcast %cst_1 : f32 to vector<2x1xf32>
    %6 = arith.maximumf %4, %5 : vector<2x1xf32>
    %7 = vector.broadcast %6 : vector<2x1xf32> to vector<2x128xf32>
    %8 = arith.divf %0, %7 : vector<2x128xf32>
    %c0_2 = arith.constant 0 : index
    %c0_3 = arith.constant 0 : index
    %9 = vector.load %arg1[%c0_2, %c0_3] : memref<128x128xf32, #tpu.memory_space<vmem>>, vector<128x128xf32>
    %cst_4 = arith.constant dense<0.000000e+00> : vector<2x128xf32>
    %10 = tpu.matmul %8, %9, %cst_4 {dimension_numbers = #tpu.dot_dimension_numbers<[1], [0], [0], [1], [0, 0, 1, 1], [], []>} : vector<2x128xf32>, vector<128x128xf32>, vector<2x128xf32> -> vector<2x128xf32>
    %c0_5 = arith.constant 0 : index
    %c0_6 = arith.constant 0 : index
    %11 = vector.load %arg3[%c0_5, %c0_6] : memref<2x128xf32, #tpu.memory_space<vmem>>, vector<2x128xf32>
    tpu.vector_store %arg3[%c0_5, %c0_6], %10 {strides = array<i32>} : memref<2x128xf32, #tpu.memory_space<vmem>>, vector<2x128xf32>,
    %12 = tpu.iota {dimensions = array<i32: 1>} : vector<2x128xi32>
    %c10_i32 = arith.constant 10 : i32
    %13 = vector.broadcast %c10_i32 : i32 to vector<2x128xi32>
    %14 = arith.cmpi slt, %12, %13 : vector<2x128xi32>
    %cst_7 = arith.constant 1.000000e+00 : f32
    %15 = vector.broadcast %cst_7 : f32 to vector<2x128xf32>
    %16 = arith.mulf %10, %15 : vector<2x128xf32>
    %cst_8 = arith.constant -1.000000e+30 : f32
    %17 = vector.broadcast %cst_8 : f32 to vector<2x128xf32>
    %18 = arith.select %14, %16, %17 : vector<2x128xi1>, vector<2x128xf32>
    %cst_9 = arith.constant dense<0xFF800000> : vector<2xf32>
    %19 = vector.multi_reduction <maximumf>, %18, %cst_9 [1] : vector<2x128xf32> to vector<2xf32>
    %20 = vector.shape_cast %19 : vector<2xf32> to vector<2x1xf32>
    %21 = vector.broadcast %20 : vector<2x1xf32> to vector<2x128xf32>
    %22 = arith.subf %18, %21 : vector<2x128xf32>
    %23 = math.exp %22 : vector<2x128xf32>
    %cst_10 = arith.constant 0.000000e+00 : f32
    %24 = vector.broadcast %cst_10 : f32 to vector<2x128xf32>
    %25 = arith.select %14, %23, %24 : vector<2x128xi1>, vector<2x128xf32>
    %cst_11 = arith.constant dense<0.000000e+00> : vector<2xf32>
    %26 = vector.multi_reduction <add>, %25, %cst_11 [1] : vector<2x128xf32> to vector<2xf32>
    %27 = vector.shape_cast %26 : vector<2xf32> to vector<2x1xf32>
    %28 = math.log %27 : vector<2x1xf32>
    %29 = arith.addf %28, %20 : vector<2x1xf32>
    %30 = vector.broadcast %29 : vector<2x1xf32> to vector<2x128xf32>
    %31 = arith.subf %18, %30 : vector<2x128xf32>
    %c0_12 = arith.constant 0 : index
    %c0_13 = arith.constant 0 : index
    %32 = vector.load %arg2[%c0_12, %c0_13] : memref<2x128xf32, #tpu.memory_space<vmem>>, vector<2x128xf32>
    %33 = arith.mulf %32, %31 : vector<2x128xf32>
    %cst_14 = arith.constant 0.000000e+00 : f32
    %34 = vector.broadcast %cst_14 : f32 to vector<2x128xf32>
    %35 = arith.select %14, %33, %34 : vector<2x128xi1>, vector<2x128xf32>
    %cst_15 = arith.constant dense<0.000000e+00> : vector<2xf32>
    %36 = vector.multi_reduction <add>, %35, %cst_15 [1] : vector<2x128xf32> to vector<2xf32>
    %37 = vector.shape_cast %36 : vector<2xf32> to vector<2x1xf32>
    %cst_16 = arith.constant 0.000000e+00 : f32
    %38 = vector.broadcast %cst_16 : f32 to vector<2x1xf32>
    %39 = arith.subf %38, %37 : vector<2x1xf32>
    %cst_17 = arith.constant dense<0.000000e+00> : vector<1xf32>
    %40 = vector.multi_reduction <add>, %39, %cst_17 [0] : vector<2x1xf32> to vector<1xf32>
    %41 = vector.shape_cast %40 : vector<1xf32> to vector<1x1xf32>
    %cst_18 = arith.constant 5.000000e-01 : f32
    %42 = vector.broadcast %cst_18 : f32 to vector<1x1xf32>
    %43 = arith.mulf %41, %42 : vector<1x1xf32>
    %c0_19 = arith.constant 0 : index
    %c0_20 = arith.constant 0 : index
    %44 = vector.load %arg4[%c0_19, %c0_20] : memref<1x1xf32, #tpu.memory_space<vmem>>, vector<1x1xf32>
    tpu.vector_store %arg4[%c0_19, %c0_20], %43 {strides = array<i32>} : memref<1x1xf32, #tpu.memory_space<vmem>>, vector<1x1xf32>,
    return
  }
}

</mosaic_0001>

<bundles_post_ra>
// kernel: lls_forward.3
= control target key start
LH: loop header
LB: loop body
LE: loop exit
PB: predicated region body
PF: predicated region fallthrough
CT: control target
= control target key end

     0   :  { %10 = vsyncpa [#allocation3], 0  ;;  %vm20_vm0 = vcmask 1041408   ;;  %v321_v4 = vmov 0.0|0.0   ;;  %s437_s0 = inlined_call_operand.vmem [shape: f32[2,128], index: 0, kind: input, shape index: {}]   ;;  %s438_s1 = inlined_call_operand.vmem [shape: f32[128,128], index: 1, kind: input, shape index: {}]   ;;  %s439_s2 = inlined_call_operand.vmem [shape: f32[2,128], index: 2, kind: input, shape index: {}]   ;;  %s440_s3 = inlined_call_operand.hbm [shape: f32[2,128], index: 3, kind: output, shape index: {0}]   ;;  %s441_s4 = inlined_call_operand.hbm [shape: f32[1,1], index: 4, kind: output, shape index: {1}]  }
   0x1   :  { %v18_v0 = vld [vmem:[%s437_s0] sm:$0x3]  ;;  %v35_v2 = vld [vmem:[%s438_s1 + $0x8] sm:$0xff]  ;;  %236 = vmatprep.subr.bf16.mxu0 %v321_v4 }
   0x2   :  { %v34_v1 = vld [vmem:[%s438_s1] sm:$0xff]  ;;  %v19_v3 = vmul.f32 %v18_v0, %v18_v0 }
   0x3   :  { %v237_v5 = vpack.c.bf16 %v35_v2, %v34_v1 }
   0x4   :  { %11 = vsyncpa [#allocation5], 0  ;;  %v21_v6 = vsel %vm20_vm0, %v19_v3, 0.0  ;;  %v36_v7 = vld [vmem:[%s438_s1 + $0x10] sm:$0xff]  ;;  %v37_v8 = vld [vmem:[%s438_s1 + $0x18] sm:$0xff]  ;;  %vm322_vm1 = vmmov 0   ;;  %v121_v38 = vlaneseq }
   0x5   :  { %238 = vmatpush3.bf16.msra.mxu0 %v237_v5  ;;  %22 = vadd.xlane.f32.xlu0 %v21_v6  ;;  %v240_v9 = vpack.c.bf16 %v37_v8, %v36_v7  ;;  %v38_v10 = vld [vmem:[%s438_s1 + $0x20] sm:$0xff]  ;;  %v39_v11 = vld [vmem:[%s438_s1 + $0x28] sm:$0xff]  ;;  %v40_v13 = vld [vmem:[%s438_s1 + $0x30] sm:$0xff]  ;;  %v323_v24 = vmov 0.0   ;;  %s324_s22 = smov [#allocation2]  }
   0x6   :  { %239 = vmatprep.subr.bf16.mxu0 %v321_v4  ;;  %v243_v12 = vpack.c.bf16 %v39_v11, %v38_v10  ;;  %v41_v14 = vld [vmem:[%s438_s1 + $0x38] sm:$0xff]  ;;  %v42_v16 = vld [vmem:[%s438_s1 + $0x40] sm:$0xff]  ;;  %v43_v17 = vld [vmem:[%s438_s1 + $0x48] sm:$0xff]  ;;  %233 = vmatprep.mubr.msk.f32.mxu0 %vm322_vm1, %v323_v24  ;;  %v122_v39 = vand.u32 127, %v121_v38  ;;  %s162_s23 = sshll.u32 %s324_s22, 4  ;;  %s163_s23 = int_to_ptr.vmem [resolvable:$true] %s162_s23 }
   0x7   :  { %v246_v15 = vpack.c.bf16 %v41_v14, %v40_v13  ;;  %v249_v18 = vpack.c.bf16 %v43_v17, %v42_v16  ;;  %v44_v19 = vld [vmem:[%s438_s1 + $0x50] sm:$0xff]  ;;  %v45_v20 = vld [vmem:[%s438_s1 + $0x58] sm:$0xff]  ;;  %v46_v22 = vld [vmem:[%s438_s1 + $0x60] sm:$0xff]  ;;  %s273_s24 = scalar_lea.vmem %s163_s23, 32  ;;  %p278_p1 = scmp.lt.s32.totalorder %s163_s23, %s163_s23 }
   0x8   :  { %v252_v21 = vpack.c.bf16 %v45_v20, %v44_v19  ;;  %v47_v23 = vld [vmem:[%s438_s1 + $0x68] sm:$0xff]  ;;  %v48_v26 = vld [vmem:[%s438_s1 + $0x70] sm:$0xff]  ;;  %v49_v27 = vld [vmem:[%s438_s1 + $0x78] sm:$0xff]  ;;  %vm123_vm4 = vcmp.lt.s32.totalorder %v122_v39, 10  ;;  %p274_p0 = scmp.ne.s32.totalorder %s163_s23, %s273_s24  ;;  %p279_p2 = scmp.lt.s32.totalorder %s273_s24, %s273_s24 }
   0x9   :  { %241 = vmatpush3.bf16.msra.mxu0 %v240_v9  ;;  %v255_v25 = vpack.c.bf16 %v47_v23, %v46_v22  ;;  %v258_v28 = vpack.c.bf16 %v49_v27, %v48_v26  ;;  %v139_v54 = vld [vmem:[%s439_s2] sm:$0x3] }
   0xa   :  { %242 = vmatprep.subr.bf16.mxu0 %v321_v4  ;;  %p280_p3 = por %p279_p2, %p278_p1 }
   0xc   :  { %p281_p4 = pnand %p280_p3, %p274_p0 }
   0xd   :  { %244 = vmatpush3.bf16.msra.mxu0 %v243_v12 }
   0xe   :  { %245 = vmatprep.subr.bf16.mxu0 %v321_v4 }
  0x11   :  { %247 = vmatpush3.bf16.msra.mxu0 %v246_v15 }
  0x12   :  { %248 = vmatprep.subr.bf16.mxu0 %v321_v4 }
  0x15   :  { %250 = vmatpush3.bf16.msra.mxu0 %v249_v18 }
  0x16   :  { %251 = vmatprep.subr.bf16.mxu0 %v321_v4 }
  0x19   :  { %253 = vmatpush3.bf16.msra.mxu0 %v252_v21 }
  0x1a   :  { %254 = vmatprep.subr.bf16.mxu0 %v321_v4 }
  0x1d   :  { %256 = vmatpush3.bf16.msra.mxu0 %v255_v25 }
  0x1e   :  { %257 = vmatprep.subr.bf16.mxu0 %v321_v4 }
  0x21   :  { %259 = vmatpush3.bf16.msra.mxu0 %v258_v28 }
  0x92   :  { %v23_v29 = vpop.xlane.xlu0 %22 }
  0x93   :  { %265 = vrsqrt.f32 %v23_v29  ;;  %vm26_vm2 = vcmp.eq.f32.partialorder %v23_v29, inf  ;;  %v29_v32 = vand.u32 2147483648, %v23_v29  ;;  %vm28_vm3 = vcmp.eq.f32.partialorder %v23_v29, 0.0 }
  0x9d   :  { %v266_v30 = vpop.eup %265 }
  0x9e   :  { %v25_v31 = vmul.f32 %v266_v30, %v23_v29 }
  0xa0   :  { %v27_v33 = vsel %vm26_vm2, %v23_v29, %v25_v31 }
  0xa1   :  { %v30_v34 = vsel %vm28_vm3, %v29_v32, %v27_v33 }
  0xa2   :  { %v31_v35 = vmax.f32 %v30_v34, 1e-12 }
  0xa4   :  { %267 = vrcp.f32 %v31_v35 }
  0xae   :  { %v268_v36 = vpop.eup %267 }
  0xaf   :  { %v33_v37 = vmul.f32 %v268_v36, %v18_v0 }
  0xb1   :  { %234 = vmatmul.mubr.f32.vlgmr.msra.gmra.mrb[0].mxu0 %v33_v37 }
 0x184   :  { %v116_v40 = vpop.f32.mrb[0].mxu0 }
 0x185   :  { %v124_v41 = vsel %vm123_vm4, %v116_v40, -1e+30  ;;  %120 = vst [vmem:[#allocation2] sm:$0x3] %v116_v40  ;;  %v235_v42 = vpop.f32.mrb[1].mxu0 }
 0x186   :  { %v125_v43 = vsel %vm20_vm0, %v124_v41, -inf }
 0x187   :  { %126 = vmax.xlane.f32.xlu0 %v125_v43 }
 0x214   :  { %v127_v44 = vpop.xlane.xlu0 %126 }
 0x215   :  { %v128_v45 = vsub.f32 %v124_v41, %v127_v44 }
 0x217   :  { %v129_v46 = vmul.f32 1.442695, %v128_v45 }
 0x219   :  { %269 = vpow2.f32 %v129_v46 }
 0x223   :  { %v270_v47 = vpop.eup %269 }
 0x224   :  { %v131_v48 = vsel %vm123_vm4, %v270_v47, 0.0 }
 0x225   :  { %v132_v49 = vsel %vm20_vm0, %v131_v48, 0.0 }
 0x226   :  { %133 = vadd.xlane.f32.xlu1 %v132_v49 }
 0x2b3   :  { %v134_v50 = vpop.xlane.xlu1 %133 }
 0x2b4   :  { %271 = vlog2.f32 %v134_v50 }
 0x2be   :  { %v272_v51 = vpop.eup %271 }
 0x2bf   :  { %v136_v52 = vmul.f32 0.6931472, %v272_v51 }
 0x2c1   :  { %v137_v53 = vadd.f32 %v136_v52, %v127_v44 }
 0x2c3   :  { %v138_v55 = vsub.f32 %v124_v41, %v137_v53 }
 0x2c5   :  { %v140_v56 = vmul.f32 %v139_v54, %v138_v55 }
 0x2c7   :  { %v141_v57 = vsel %vm123_vm4, %v140_v56, 0.0 }
 0x2c8   :  { %v142_v58 = vsel %vm20_vm0, %v141_v57, 0.0 }
 0x2c9   :  { %143 = vadd.xlane.f32.xlu1 %v142_v58 }
 0x2ca   :  { %284 = shalt.err (!%p281_p4)
}
 0x2cb   :  { %s285_s2 = scalar_lea.hbm %s440_s3, 32 }
 0x2cc   :  { %p286_p5 = scmp.ne.s32.totalorder %s440_s3, %s285_s2  ;;  %p289_p6 = scmp.lt.u32.totalorder %s285_s2, %s440_s3 }
 0x2ce   :  { %p291_p7 = pnand %p289_p6, %p286_p5 }
 0x2d0   :  { %294 = shalt.err (!%p291_p7)
}
 0x2d1   :  { %165 = dma.vmem_to_hbm [thread:$0]  %s163_s23, 32, %s440_s3, [#allocation3]   ;;  %vm154_vm5 = vcmask 0  }
 0x2d2   :  { %s325_s7 = smov [#allocation4]  }
 0x2d3   :  { %s172_s8 = sshll.u32 %s325_s7, 4  ;;  %s173_s8 = int_to_ptr.vmem [resolvable:$true] %s172_s8 }
 0x2d4   :  { %s295_s9 = scalar_lea.vmem %s173_s8, 16  ;;  %s299_s10 = scalar_lea.vmem %s173_s8, 32 }
 0x2d5   :  { %p296_p8 = scmp.ne.s32.totalorder %s173_s8, %s295_s9  ;;  %p300_p9 = scmp.lt.s32.totalorder %s173_s8, %s173_s8 }
 0x2d6   :  { %p301_p10 = scmp.lt.s32.totalorder %s299_s10, %s295_s9 }
 0x2d8   :  { %p302_p11 = por %p301_p10, %p300_p9 }
 0x2da   :  { %p303_p12 = pnand %p302_p11, %p296_p8 }
 0x356   :  { %v144_v59 = vpop.xlane.xlu1 %143 }
 0x357   :  { %v145_v60 = vsub.f32 0.0, %v144_v59 }
 0x359   :  { %v146_v61 = vsel %vm20_vm0, %v145_v60, 0.0 }
 0x35a   :  { %v147_v62 = vrot.slane %v146_v61, 4 }
 0x35c   :  { %v148_v63 = vadd.f32 %v147_v62, %v146_v61 }
 0x35e   :  { %v149_v0 = vrot.slane %v148_v63, 2 }
 0x360   :  { %v150_v1 = vadd.f32 %v149_v0, %v148_v63 }
 0x362   :  { %v151_v2 = vrot.slane %v150_v1, 1 }
 0x364   :  { %v152_v3 = vadd.f32 %v151_v2, %v150_v1 }
 0x366   :  { %v153_v4 = vmul.f32 0.5, %v152_v3 }
 0x368   :  { %155 = vst.msk [vmem:[#allocation4] sm:$0x1] %vm154_vm5, %v153_v4 }
 0x369   :  { %306 = shalt.err (!%p303_p12)
}
 0x36a   :  { %s307_s12 = scalar_lea.hbm %s441_s4, 16 }
 0x36b   :  { %p308_p13 = scmp.ne.s32.totalorder %s441_s4, %s307_s12  ;;  %p311_p0 = scmp.lt.u32.totalorder %s307_s12, %s441_s4 }
 0x36d   :  { %p313_p1 = pnand %p311_p0, %p308_p13 }
 0x36f   :  { %316 = shalt.err (!%p313_p1)
}
 0x370   :  { %175 = dma.vmem_to_hbm [thread:$0]  %s173_s8, 16, %s441_s4, [#allocation5]  }
 0x371   :  { %317 = dma.done.wait [#allocation3], 32  }
 0x372   :  { %318 = vsyncadd [#allocation3], 4294967264 }
 0x373   :  { %319 = dma.done.wait [#allocation5], 16  }
 0x374   :  { %320 = vsyncadd [#allocation5], 4294967280 }
 0x375   :  { %182 = vsyncpa [#allocation3], 1 }
 0x376   :  { %183 = vsyncpa [#allocation5], 1 }

// kernel: lls_forward.2
= control target key start
LH: loop header
LB: loop body
LE: loop exit
PB: predicated region body
PF: predicated region fallthrough
CT: control target
= control target key end

     0   :  { %s3170_s18 = smov 0   ;;  %s3172_s19 = smov 0   ;;  %s4695_s0 = inlined_call_operand.vmem [shape: f32[2,4,18,18], index: 0, kind: input, shape index: {}]   ;;  %s4696_s1 = inlined_call_operand.vmem [shape: f32[8,36], index: 1, kind: input, shape index: {}]   ;;  %s4697_s2 = inlined_call_operand.vmem [shape: f32[8,1], index: 2, kind: input, shape index: {}]   ;;  %s4698_s3 = inlined_call_operand.vmem [shape: f32[256,16], index: 3, kind: input, shape index: {}]   ;;  %s4699_s4 = inlined_call_operand.vmem [shape: f32[2,8,256], index: 4, kind: output, shape index: {0}]   ;;  %s4700_s5 = inlined_call_operand.vmem [shape: f32[2,8,16], index: 5, kind: output, shape index: {1}]  }
   0x1   :  { %s3174_s20 = smov 0  }
   0x2 LB: > { %s28_s21 = sadd.s32 1, %s3121_s19  ;;  %p2690_p0 = scmp.ge.s32.totalorder %s3125_s20, 1  ;;  %s3125_s20 = sphi %s3174_s20, %s16_s20   ;;  %s3121_s19 = sphi %s3172_s19, %s4778_s19   ;;  %s3117_s18 = sphi %s3170_s18, %s4777_s18  }
   0x3   : > { %p30_p1 = scmp.ge.s32.totalorder %s28_s21, 2  ;;  %p204_p2 = scmp.lt.s32.totalorder %s3125_s20, 3 }
   0x5   : > { %s4780_s21 = smov (%p30_p1, %s28_s21), 0  ;;  %p205_p3 = pnand %p2690_p0, %p204_p2 }
   0x7   : > { %208 = sbr.rel (%p205_p3) target bundleno = 855 (0x357), region = 36 }
   0xe   : > { %p240_p4 = scmp.lt.s32.totalorder %s3117_s18, 1  ;;  %s3127_s26 = smov 127   ;;  %vm956_vm0 = vcmask 1046528   ;;  %v3128_v4 = vmov 1983009808   ;;  %v276_v6 = vlaneseq  ;;  %v4701_v11 = vmov 0.0  }
   0xf   : > { %v274_v5 = vunpack.c.l.s4 %v3128_v4  ;;  %2460 = vmatprep.mubr.f32.mxu0 %v4701_v11  ;;  %s3130_s27 = smov 126   ;;  %vm1651_vm1 = vcmask 1045504   ;;  %s3132_s28 = smov 32   ;;  %vm463_vm2 = vcmask 130048   ;;  %vm465_vm3 = vcmask 261120  }
  0x10   : > { %s4782_s18 = smov (!%p240_p4, %s3117_s18), 1  ;;  %v3246_v24 = vshrl.u32 %v276_v6, 7  ;;  %s3133_s29 = smov 64   ;;  %vm467_vm4 = vcmask 392192   ;;  %vm469_vm5 = vcmask 523264   ;;  %vm471_vm6 = vcmask 654336  }
  0x11   : > { %s2776_s22 = smul.u32 96, %s4782_s18  ;;  %v275_v23 = vunpack.c.0.s8 %v274_v5  ;;  %s3134_s30 = smov 16   ;;  %vm473_vm7 = vcmask 785408   ;;  %vm475_vm8 = vcmask 916480   ;;  %vm2370_vm9 = vcmask 1043456  }
  0x12   : > { %s3135_s6 = smov 48   ;;  %s3136_s7 = smov 96   ;;  %vm2386_vm10 = vcmask 293888  }
  0x13   : > { %s3194_s25 = scalar_lea.vmem %s4695_s0, %s2776_s22  ;;  %v3277_v35 = vsub.s32 %v275_v23, %v3246_v24  ;;  %s3137_s8 = smov 80  }
  0x14   : > { %v3197_v0 = vld [vmem:[%s3194_s25 + $0x38] sm:$0xff]  ;;  %v3200_v1 = vld [vmem:[%s3194_s25 + $0x8] sm:$0xff]  ;;  %v3207_v2 = vld [vmem:[%s3194_s25 + $0x50] sm:$0xff]  ;;  %s3138_s9 = smov 112   ;;  %s2700_s17 = sshll.u32 %s4782_s18, 4 }
  0x15   : > { %502 = vrot.lane.b32.xlu1 %v3197_v0, %s3127_s26  ;;  %494 = vrot.lane.b32.xlu0 %v3200_v1, %s3127_s26  ;;  %v3210_v3 = vld [vmem:[%s3194_s25 + $0x20] sm:$0xff]  ;;  %v958_v8 = vrot.slane %v3200_v1, 1  ;;  %v973_v9 = vrot.slane %v3207_v2, 1  ;;  %v968_v10 = vrot.slane %v3197_v0, 1  ;;  %v3218_v12 = vld [vmem:[%s3194_s25 + $0x28] sm:$0x3]  ;;  %v339_v57 = vcombine.low %v3200_v1, %v3197_v0  ;;  %s253_s24 = scalar_lea.vmem %s4699_s4, %s2700_s17 }
  0x16   : > { %v963_v7 = vrot.slane %v3210_v3, 1  ;;  %v3221_v13 = vld [vmem:[%s3194_s25 + $0x10] sm:$0x3]  ;;  %v3224_v14 = vld [vmem:[%s3194_s25 + $0x58] sm:$0x3]  ;;  %v965_v15 = vrot.slane %v3218_v12, 1  ;;  %v355_v58 = vcombine.low %v3210_v3, %v3207_v2  ;;  %v340_v23 = vcombine.high %v3200_v1, %v3197_v0 }
  0x17   : > { %v960_v16 = vrot.slane %v3221_v13, 1  ;;  %v975_v17 = vrot.slane %v3224_v14, 1  ;;  %v3230_v18 = vld [vmem:[%s3194_s25 + $0x40] sm:$0x3]  ;;  %v3238_v20 = vld [vmem:[%s3194_s25 + $0x18] sm:$0xff]  ;;  %v3270_v32 = vld [vmem:[%s3194_s25 + $0x48] sm:$0xff]  ;;  %v3347_v59 = vrot.slane %v339_v57, %v3277_v35 }
  0x18   : > { %v970_v19 = vrot.slane %v3230_v18, 1  ;;  %v3241_v21 = vld [vmem:[%s3194_s25] sm:$0xff]  ;;  %v3244_v22 = vsel %vm956_vm0, %v963_v7, %v965_v15  ;;  %v3273_v33 = vld [vmem:[%s3194_s25 + $0x30] sm:$0xff]  ;;  %v962_v34 = vrot.slane %v3238_v20, 1  ;;  %v972_v37 = vrot.slane %v3270_v32, 1  ;;  %s2694_s25 = sshll.u32 %s4782_s18, 3 }
  0x19   : > { %506 = vrot.lane.b32.xlu1 %v3207_v2, %s3127_s26  ;;  %498 = vrot.lane.b32.xlu0 %v3210_v3, %s3127_s26  ;;  %v3249_v25 = vsel %vm956_vm0, %v973_v9, %v975_v17  ;;  %v3252_v26 = vsel %vm956_vm0, %v958_v8, %v960_v16  ;;  %v957_v36 = vrot.slane %v3241_v21, 1  ;;  %v967_v38 = vrot.slane %v3273_v33, 1 }
  0x1a   : > { %v1069_v27 = vcombine.low %v3244_v22, %v3249_v25  ;;  %v1070_v28 = vcombine.high %v3244_v22, %v3249_v25  ;;  %v3259_v29 = vsel %vm956_vm0, %v968_v10, %v970_v19  ;;  %v3293_v41 = vsel %vm956_vm0, %v962_v34, %v963_v7 }
  0x1b   : > { %v1053_v30 = vcombine.low %v3252_v26, %v3259_v29  ;;  %v1054_v31 = vcombine.high %v3252_v26, %v3259_v29  ;;  %v3296_v42 = vsel %vm956_vm0, %v957_v36, %v958_v8  ;;  %v3299_v43 = vsel %vm956_vm0, %v972_v37, %v973_v9 }
  0x1c   : > { %v3287_v39 = vrot.slane %v1069_v27, %v3277_v35  ;;  %v3302_v44 = vsel %vm956_vm0, %v967_v38, %v968_v10  ;;  %v1001_v45 = vcombine.low %v3293_v41, %v3299_v43  ;;  %v1002_v46 = vcombine.high %v3293_v41, %v3299_v43 }
  0x1d   : > { %496 = vrot.lane.b32.xlu1 %v3238_v20, %s3127_s26  ;;  %492 = vrot.lane.b32.xlu0 %v3241_v21, %s3127_s26  ;;  %v3290_v40 = vrot.slane %v1053_v30, %v3277_v35  ;;  %v985_v47 = vcombine.low %v3296_v42, %v3302_v44  ;;  %v986_v48 = vcombine.high %v3296_v42, %v3302_v44  ;;  %v1655_v57 = vrot.slane %v3221_v13, 2 }
  0x1e   : > { %v3317_v49 = vrot.slane %v1001_v45, %v3277_v35  ;;  %v3323_v51 = vrot.slane %v1070_v28, %v3277_v35  ;;  %v3326_v52 = vrot.slane %v1054_v31, %v3277_v35  ;;  %v3333_v55 = vrot.slane %v1002_v46, %v3277_v35 }
  0x1f   : > { %v3320_v50 = vrot.slane %v985_v47, %v3277_v35  ;;  %v1086_v53 = vcombine.high %v3290_v40, %v3287_v39  ;;  %v3336_v56 = vrot.slane %v986_v48, %v3277_v35  ;;  %v3350_v60 = vrot.slane %v355_v58, %v3277_v35 }
  0x20   : > { %v1101_v61 = vcombine.low %v3326_v52, %v3323_v51  ;;  %v272_v62 = vcombine.high %v3241_v21, %v3273_v33  ;;  %v288_v63 = vcombine.high %v3238_v20, %v3270_v32  ;;  %v271_v4 = vcombine.low %v3241_v21, %v3273_v33 }
  0x21   : > { %504 = vrot.lane.b32.xlu1 %v3270_v32, %s3127_s26  ;;  %500 = vrot.lane.b32.xlu0 %v3273_v33, %s3127_s26  ;;  %v1018_v54 = vcombine.high %v3320_v50, %v3317_v49  ;;  %v287_v5 = vcombine.low %v3238_v20, %v3270_v32  ;;  %v372_v6 = vcombine.high %v3347_v59, %v3350_v60  ;;  %v1653_v45 = vrot.slane %v3200_v1, 2 }
  0x22   : > { %v3373_v9 = vrot.slane %v272_v62, %v3277_v35  ;;  %v3376_v10 = vrot.slane %v288_v63, %v3277_v35  ;;  %v3379_v15 = vrot.slane %v271_v4, %v3277_v35  ;;  %v356_v27 = vcombine.high %v3210_v3, %v3207_v2 }
  0x23   : > { %v3382_v16 = vrot.slane %v287_v5, %v3277_v35  ;;  %v3401_v31 = vrot.slane %v340_v23, %v3277_v35  ;;  %v1658_v47 = vrot.slane %v3210_v3, 2  ;;  %v1660_v48 = vrot.slane %v3218_v12, 2 }
  0x24   : > { %4724 = vst [vmem:[#allocation2_spill] sm:$0xff] %v3373_v9  ;;  %4725 = vst [vmem:[#allocation3_spill] sm:$0xff] %v3376_v10  ;;  %v319_v17 = vcombine.low %v3373_v9, %v3376_v10  ;;  %v3404_v34 = vrot.slane %v356_v27, %v3277_v35  ;;  %v3436_v13 = vsel %vm1651_vm1, %v1653_v45, %v1655_v57  ;;  %v1663_v63 = vrot.slane %v3197_v0, 2 }
  0x25   : > { %728 = vrot.lane.b32.xlu1 %v3210_v3, %s3130_s27  ;;  %724 = vrot.lane.b32.xlu0 %v3200_v1, %s3130_s27  ;;  %v304_v28 = vcombine.high %v3379_v15, %v3382_v16  ;;  %v1668_v1 = vrot.slane %v3207_v2, 2  ;;  %v1670_v3 = vrot.slane %v3224_v14, 2  ;;  %v3433_v12 = vsel %vm1651_vm1, %v1658_v47, %v1660_v48 }
  0x26   : > { %v1665_v4 = vrot.slane %v3230_v18, 2  ;;  %v1652_v18 = vrot.slane %v3241_v21, 2  ;;  %v1667_v27 = vrot.slane %v3270_v32, 2  ;;  %v1662_v48 = vrot.slane %v3273_v33, 2 }
  0x28   : > { %v3448_v14 = vsel %vm1651_vm1, %v1663_v63, %v1665_v4  ;;  %v3468_v23 = vsel %vm1651_vm1, %v1652_v18, %v1653_v45 }
  0x29   : > { %736 = vrot.lane.b32.xlu1 %v3207_v2, %s3130_s27  ;;  %732 = vrot.lane.b32.xlu0 %v3197_v0, %s3130_s27  ;;  %v3445_v2 = vsel %vm1651_vm1, %v1668_v1, %v1670_v3  ;;  %v1657_v0 = vrot.slane %v3238_v20, 2  ;;  %4726 = vst [vmem:[#allocation4_spill] sm:$0xff] %v3468_v23 }
  0x2b   : > { %v3465_v5 = vsel %vm1651_vm1, %v1657_v0, %v1658_v47 }
  0x2d   : > { %726 = vrot.lane.b32.xlu1 %v3238_v20, %s3130_s27  ;;  %722 = vrot.lane.b32.xlu0 %v3241_v21, %s3130_s27  ;;  %v3477_v20 = vsel %vm1651_vm1, %v1667_v27, %v1668_v1  ;;  %v3480_v21 = vsel %vm1651_vm1, %v1662_v48, %v1663_v63 }
  0x2e   : > { %4727 = vst [vmem:[#allocation5_spill] sm:$0xff] %v3480_v21 }
  0x31   : > { %734 = vrot.lane.b32.xlu1 %v3270_v32, %s3130_s27  ;;  %730 = vrot.lane.b32.xlu0 %v3273_v33, %s3130_s27 }
  0x35   : > { %1427 = vrot.lane.b32.xlu1 %v3244_v22, %s3130_s27  ;;  %1423 = vrot.lane.b32.xlu0 %v3252_v26, %s3130_s27 }
  0x39   : > { %1435 = vrot.lane.b32.xlu1 %v3249_v25, %s3130_s27  ;;  %1431 = vrot.lane.b32.xlu0 %v3259_v29, %s3130_s27 }
  0x3d   : > { %1892 = vrot.lane.b32.xlu1 %v3433_v12, %s3127_s26  ;;  %1888 = vrot.lane.b32.xlu0 %v3436_v13, %s3127_s26 }
  0x41   : > { %1900 = vrot.lane.b32.xlu1 %v3445_v2, %s3127_s26  ;;  %1896 = vrot.lane.b32.xlu0 %v3448_v14, %s3127_s26 }
  0x45   : > { %1425 = vrot.lane.b32.xlu1 %v3293_v41, %s3130_s27  ;;  %1421 = vrot.lane.b32.xlu0 %v3296_v42, %s3130_s27 }
  0x49   : > { %1433 = vrot.lane.b32.xlu1 %v3299_v43, %s3130_s27  ;;  %1429 = vrot.lane.b32.xlu0 %v3302_v44, %s3130_s27 }
  0x4d   : > { %1890 = vrot.lane.b32.xlu1 %v3465_v5, %s3127_s26  ;;  %1886 = vrot.lane.b32.xlu0 %v3468_v23, %s3127_s26 }
  0x51   : > { %1898 = vrot.lane.b32.xlu1 %v3477_v20, %s3127_s26  ;;  %1894 = vrot.lane.b32.xlu0 %v3480_v21, %s3127_s26 }
  0x55   : > { %1197 = vrot.lane.b32.xlu1 %v3244_v22, %s3127_s26  ;;  %1193 = vrot.lane.b32.xlu0 %v3252_v26, %s3127_s26  ;;  %v3131_v22 = vmov 1934713408  }
  0x59   : > { %1205 = vrot.lane.b32.xlu1 %v3249_v25, %s3127_s26  ;;  %1201 = vrot.lane.b32.xlu0 %v3259_v29, %s3127_s26  ;;  %v306_v25 = vunpack.c.l.s4 %v3131_v22 }
  0x5b   : > { %v307_v32 = vunpack.c.0.s8 %v306_v25 }
  0x5d   : > { %1195 = vrot.lane.b32.xlu1 %v3293_v41, %s3127_s26  ;;  %1191 = vrot.lane.b32.xlu0 %v3296_v42, %s3127_s26 }
  0x61   : > { %1203 = vrot.lane.b32.xlu1 %v3299_v43, %s3127_s26  ;;  %1199 = vrot.lane.b32.xlu0 %v3302_v44, %s3127_s26  ;;  %v3519_v44 = vsub.s32 %v307_v32, %v3246_v24 }
  0x63   : > { %v3533_v63 = vrot.slane %v1086_v53, %v3519_v44 }
  0x65   : > { %2118 = vrot.lane.b32.xlu0 %v3436_v13, %s3130_s27  ;;  %2122 = vrot.lane.b32.xlu1 %v3433_v12, %s3130_s27 }
  0x69   : > { %2126 = vrot.lane.b32.xlu0 %v3448_v14, %s3130_s27  ;;  %2130 = vrot.lane.b32.xlu1 %v3445_v2, %s3130_s27 }
  0x6d   : > { %2116 = vrot.lane.b32.xlu0 %v3468_v23, %s3130_s27  ;;  %2120 = vrot.lane.b32.xlu1 %v3465_v5, %s3130_s27 }
  0x71   : > { %2124 = vrot.lane.b32.xlu0 %v3480_v21, %s3130_s27  ;;  %2128 = vrot.lane.b32.xlu1 %v3477_v20, %s3130_s27 }
  0x87   : > { %v503_v26 = vpop.permute.xlu1 %502  ;;  %v495_v29 = vpop.permute.xlu0 %494 }
  0x88   : > { %v584_v33 = vcombine.low %v495_v29, %v503_v26  ;;  %v585_v58 = vcombine.high %v495_v29, %v503_v26 }
  0x8a   : > { %v3522_v45 = vrot.slane %v584_v33, %v3277_v35 }
  0x8b   : > { %v507_v41 = vpop.permute.xlu1 %506  ;;  %v499_v42 = vpop.permute.xlu0 %498 }
  0x8c   : > { %v600_v43 = vcombine.low %v499_v42, %v507_v41 }
  0x8e   : > { %v3525_v47 = vrot.slane %v600_v43, %v3277_v35  ;;  %v601_v43 = vcombine.high %v499_v42, %v507_v41 }
  0x8f   : > { %v497_v57 = vpop.permute.xlu1 %496  ;;  %v493_v1 = vpop.permute.xlu0 %492 }
  0x90   : > { %v617_v3 = vcombine.high %v3522_v45, %v3525_v47 }
  0x92   : > { %v3536_v24 = vrot.slane %v617_v3, %v3519_v44  ;;  %v3547_v3 = vrot.slane %v1018_v54, %v3519_v44  ;;  %v3560_v54 = vrot.slane %v585_v58, %v3277_v35 }
  0x93   : > { %v505_v4 = vpop.permute.xlu1 %504  ;;  %v501_v0 = vpop.permute.xlu0 %500 }
  0x94   : > { %v532_v18 = vcombine.low %v497_v57, %v505_v4  ;;  %v516_v27 = vcombine.low %v493_v1, %v501_v0  ;;  %v2814_v48 = vpack.i.bf16 %v3533_v63, %v3536_v24  ;;  %v517_v30 = vcombine.high %v493_v1, %v501_v0 }
  0x96   : > { %v540_v22 = vrot.slane %v532_v18, %v3277_v35  ;;  %v524_v25 = vrot.slane %v516_v27, %v3277_v35  ;;  %2815 = vrot.lane.b32.xlu0 %v2814_v48, %s3132_s28  ;;  %v3553_v48 = vrot.slane %v601_v43, %v3277_v35 }
  0x97   : > { %v729_v32 = vpop.permute.xlu1 %728  ;;  %v725_v53 = vpop.permute.xlu0 %724 }
  0x98   : > { %v549_v33 = vcombine.high %v524_v25, %v540_v22  ;;  %v632_v43 = vcombine.low %v3560_v54, %v3553_v48  ;;  %v548_v1 = vcombine.low %v524_v25, %v540_v22 }
  0x9a   : > { %v3550_v62 = vrot.slane %v549_v33, %v3519_v44  ;;  %v533_v33 = vcombine.high %v497_v57, %v505_v4  ;;  %v3578_v57 = vrot.slane %v517_v30, %v3277_v35  ;;  %v3589_v30 = vrot.slane %v632_v43, %v3519_v44 }
  0x9b   : > { %v737_v18 = vpop.permute.xlu1 %736  ;;  %v733_v46 = vpop.permute.xlu0 %732 }
  0x9c   : > { %v830_v27 = vcombine.low %v729_v32, %v737_v18  ;;  %v814_v37 = vcombine.low %v725_v53, %v733_v46  ;;  %v2819_v41 = vpack.i.bf16 %v3547_v3, %v3550_v62  ;;  %v3575_v58 = vrot.slane %v533_v33, %v3277_v35 }
  0x9d   : > { %v831_v8 = vcombine.high %v729_v32, %v737_v18  ;;  %v815_v7 = vcombine.high %v725_v53, %v733_v46  ;;  %v3612_v53 = vrot.slane %v319_v17, %v3519_v44 }
  0x9e   : > { %v838_v42 = vrot.slane %v830_v27, %v3277_v35  ;;  %v822_v36 = vrot.slane %v814_v37, %v3277_v35  ;;  %2820 = vrot.lane.b32.xlu0 %v2819_v41, %s3132_s28  ;;  %v3569_v27 = vrot.slane %v372_v6, %v3519_v44  ;;  %v3584_v41 = vrot.slane %v1101_v61, %v3519_v44 }
  0x9f   : > { %v727_v26 = vpop.permute.xlu1 %726  ;;  %v723_v29 = vpop.permute.xlu0 %722 }
  0xa0   : > { %v847_v38 = vcombine.high %v822_v36, %v838_v42 }
  0xa2   : > { %v3572_v37 = vrot.slane %v847_v38, %v3519_v44 }
  0xa3   : > { %v735_v4 = vpop.permute.xlu1 %734  ;;  %v731_v0 = vpop.permute.xlu0 %730 }
  0xa4   : > { %v762_v6 = vcombine.low %v727_v26, %v735_v4  ;;  %v763_v19 = vcombine.high %v727_v26, %v735_v4  ;;  %v746_v11 = vcombine.low %v723_v29, %v731_v0  ;;  %v747_v38 = vcombine.high %v723_v29, %v731_v0 }
  0xa5   : > { %v2824_v33 = vpack.i.bf16 %v3572_v37, %v3569_v27  ;;  %v564_v29 = vcombine.low %v3578_v57, %v3575_v58  ;;  %v3633_v4 = vrot.slane %v548_v1, %v3519_v44  ;;  %v3639_v0 = vrot.slane %v815_v7, %v3277_v35 }
  0xa6   : > { %v3592_v22 = vrot.slane %v762_v6, %v3277_v35  ;;  %v3595_v25 = vrot.slane %v763_v19, %v3277_v35  ;;  %v3598_v61 = vrot.slane %v746_v11, %v3277_v35  ;;  %v3601_v26 = vrot.slane %v747_v38, %v3277_v35 }
  0xa7   : > { %2825 = vrot.lane.b32.xlu1 %v2824_v33, %s3132_s28  ;;  %v3604_v46 = vpop.permute.xlu1 %1427  ;;  %v3606_v32 = vpop.permute.xlu0 %1423  ;;  %v3618_v11 = vrot.slane %v304_v28, %v3519_v44  ;;  %v4730_v19 = vcombine.low %v3320_v50, %v3317_v49  ;;  %4732 = vst [vmem:[#allocation9_spill] sm:$0xff] %v3633_v4  ;;  %v3636_v28 = vrot.slane %v831_v8, %v3277_v35 }
  0xa8   : > { %4728 = vst [vmem:[#allocation6_spill] sm:$0xff] %v3595_v25  ;;  %4729 = vst [vmem:[#allocation7_spill] sm:$0xff] %v3601_v26  ;;  %v779_v43 = vcombine.high %v3598_v61, %v3592_v22  ;;  %v794_v17 = vcombine.low %v3601_v26, %v3595_v25  ;;  %v846_v49 = vcombine.low %v822_v36, %v838_v42  ;;  %v4734_v42 = vmov 0.0  }
  0xa9   : > { %v3624_v18 = vrot.slane %v4730_v19, %v3519_v44  ;;  %v2829_v50 = vpack.i.bf16 %v3584_v41, %v3589_v30  ;;  %v4733_v7 = vcombine.low %v3336_v56, %v3333_v55  ;;  %v580_v33 = vcombine.high %v3633_v4, %v4734_v42 }
  0xaa   : > { %v3644_v6 = vrot.slane %v794_v17, %v3519_v44  ;;  %v3647_v38 = vrot.slane %v779_v43, %v3519_v44  ;;  %v3665_v43 = vrot.slane %v564_v29, %v3519_v44  ;;  %v4735_v17 = vcombine.low %v3347_v59, %v3350_v60 }
  0xab   : > { %4731 = vst [vmem:[#allocation8_spill] sm:$0xff] %v3624_v18  ;;  %2830 = vrot.lane.b32.xlu1 %v2829_v50, %s3133_s29  ;;  %v3650_v1 = vpop.permute.xlu1 %1435  ;;  %v3652_v8 = vpop.permute.xlu0 %1431  ;;  %v3658_v36 = vrot.slane %v4733_v7, %v3519_v44  ;;  %v1049_v19 = vcombine.high %v3624_v18, %v4734_v42  ;;  %v862_v10 = vcombine.low %v3639_v0, %v3636_v28 }
  0xac   : > { %v3671_v50 = vrot.slane %v4735_v17, %v3519_v44  ;;  %v2854_v7 = vpack.i.bf16 %v3644_v6, %v3612_v53  ;;  %v2834_v4 = vpack.i.bf16 %v3647_v38, %v3618_v11  ;;  %v3680_v18 = vrot.slane %v846_v49, %v3519_v44 }
  0xad   : > { %v616_v60 = vcombine.low %v3522_v45, %v3525_v47  ;;  %v633_v17 = vcombine.high %v3560_v54, %v3553_v48  ;;  %v4738_v49 = vcombine.low %v3401_v31, %v3404_v34  ;;  %v2839_v26 = vpack.i.bf16 %v3658_v36, %v3665_v43 }
  0xae   : > { %4736 = vst [vmem:[#allocation10_spill] sm:$0xff] %v3671_v50  ;;  %4737 = vst [vmem:[#allocation11_spill] sm:$0xff] %v3680_v18  ;;  %2835 = vrot.lane.b32.xlu0 %v2834_v4, %s3132_s28  ;;  %v403_v9 = vcombine.high %v3671_v50, %v4734_v42  ;;  %v2864_v4 = vpack.i.bf16 %v1049_v19, %v580_v33  ;;  %v878_v25 = vcombine.high %v3680_v18, %v4734_v42 }
  0xaf   : > { %2855 = vrot.lane.b32.xlu1 %v2854_v7, %s3133_s29  ;;  %v3684_v29 = vpop.permute.xlu1 %1892  ;;  %v3686_v59 = vpop.permute.xlu0 %1888  ;;  %v3698_v7 = vrot.slane %v4738_v49, %v3519_v44  ;;  %v3705_v45 = vrot.slane %v862_v10, %v3519_v44  ;;  %v1118_v54 = vcombine.high %v3533_v63, %v4734_v42  ;;  %v778_v33 = vcombine.low %v3598_v61, %v3592_v22 }
  0xb0   : > { %v4739_v10 = vcombine.high %v3326_v52, %v3323_v51  ;;  %v3724_v49 = vrot.slane %v616_v60, %v3519_v44  ;;  %v2869_v50 = vpack.i.bf16 %v878_v25, %v403_v9  ;;  %v649_v22 = vcombine.high %v3536_v24, %v4734_v42 }
  0xb1   : > { %v2844_v63 = vpack.i.bf16 %v3705_v45, %v3698_v7  ;;  %v3737_v51 = vrot.slane %v633_v17, %v3519_v44  ;;  %v879_v24 = vcombine.high %v3572_v37, %v4734_v42  ;;  %v3760_v60 = vrot.slane %v778_v33, %v3519_v44 }
  0xb2   : > { %2840 = vrot.lane.b32.xlu0 %v2839_v26, %s3133_s29  ;;  %v3721_v19 = vrot.slane %v4739_v10, %v3519_v44  ;;  %4740 = vst [vmem:[#allocation12_spill] sm:$0xff] %v3724_v49  ;;  %v4741_v26 = vcombine.low %v3290_v40, %v3287_v39  ;;  %v404_v39 = vcombine.high %v3569_v27, %v4734_v42 }
  0xb3   : > { %2865 = vrot.lane.b32.xlu1 %v2864_v4, %s3134_s30  ;;  %v3709_v47 = vpop.permute.xlu1 %1900  ;;  %v3711_v48 = vpop.permute.xlu0 %1896  ;;  %v4744_v40 = vcombine.low %v3379_v15, %v3382_v16  ;;  %v648_v25 = vcombine.high %v3724_v49, %v4734_v42  ;;  %4746 = vst [vmem:[#allocation16_spill] sm:$0xff] %v3760_v60  ;;  %v2874_v16 = vpack.i.bf16 %v1118_v54, %v649_v22 }
  0xb4   : > { %v3730_v4 = vrot.slane %v4741_v26, %v3519_v44  ;;  %v1994_v27 = vcombine.low %v3684_v29, %v3709_v47  ;;  %v1978_v15 = vcombine.low %v3686_v59, %v3711_v48  ;;  %v2849_v17 = vpack.i.bf16 %v3721_v19, %v3737_v51 }
  0xb5   : > { %v3751_v9 = vrot.slane %v4744_v40, %v3519_v44  ;;  %v1119_v37 = vcombine.high %v3584_v41, %v4734_v42  ;;  %v1529_v10 = vcombine.low %v3604_v46, %v3650_v1  ;;  %v1513_v33 = vcombine.low %v3606_v32, %v3652_v8 }
  0xb6   : > { %4742 = vst [vmem:[#allocation13_spill] sm:$0xff] %v3730_v4  ;;  %2845 = vrot.lane.b32.xlu0 %v2844_v63, %s3133_s29  ;;  %v2889_v41 = vpack.i.bf16 %v879_v24, %v404_v39  ;;  %v650_v40 = vcombine.high %v3589_v30, %v4734_v42  ;;  %v810_v18 = vcombine.high %v3760_v60, %v4734_v42 }
  0xb7   : > { %2870 = vrot.lane.b32.xlu1 %v2869_v50, %s3134_s30  ;;  %v3741_v52 = vpop.permute.xlu1 %1425  ;;  %v3743_v61 = vpop.permute.xlu0 %1421  ;;  %4745 = vst [vmem:[#allocation15_spill] sm:$0xff] %v3751_v9  ;;  %v1117_v50 = vcombine.high %v3730_v4, %v4734_v42  ;;  %v335_v63 = vcombine.high %v3751_v9, %v4734_v42  ;;  %v1986_v49 = vrot.slane %v1978_v15, %v3277_v35 }
  0xb8   : > { %4743 = vst [vmem:[#allocation14_spill] sm:$0xff] %v3743_v61  ;;  %v336_v39 = vcombine.high %v3618_v11, %v4734_v42  ;;  %v1537_v24 = vrot.slane %v1529_v10, %v3277_v35  ;;  %v1521_v30 = vrot.slane %v1513_v33, %v3277_v35  ;;  %v2894_v15 = vpack.i.bf16 %v1119_v37, %v650_v40 }
  0xb9   : > { %v2859_v22 = vpack.i.bf16 %v1117_v50, %v648_v25  ;;  %v2879_v9 = vpack.i.bf16 %v810_v18, %v335_v63  ;;  %v811_v11 = vcombine.high %v3647_v38, %v4734_v42  ;;  %v581_v10 = vcombine.high %v3550_v62, %v4734_v42 }
  0xba   : > { %2850 = vrot.lane.b32.xlu0 %v2849_v17, %s3136_s7  ;;  %v1545_v18 = vcombine.low %v1521_v30, %v1537_v24  ;;  %v1546_v37 = vcombine.high %v1521_v30, %v1537_v24 }
  0xbb   : > { %2875 = vrot.lane.b32.xlu1 %v2874_v16, %s3135_s6  ;;  %v3776_v26 = vpop.permute.xlu1 %1433  ;;  %v3778_v54 = vpop.permute.xlu0 %1429  ;;  %v2002_v16 = vrot.slane %v1994_v27, %v3277_v35  ;;  %v1050_v27 = vcombine.high %v3547_v3, %v4734_v42  ;;  %v1748_v3 = vcombine.low %v3436_v13, %v3448_v14  ;;  %v2899_v24 = vpack.i.bf16 %v811_v11, %v336_v39 }
  0xbc   : > { %v1461_v17 = vcombine.low %v3741_v52, %v3776_v26  ;;  %v1445_v4 = vcombine.low %v3743_v61, %v3778_v54  ;;  %v1764_v61 = vcombine.low %v3433_v12, %v3445_v2 }
  0xbd   : > { %v2010_v33 = vcombine.low %v1986_v49, %v2002_v16  ;;  %v2011_v60 = vcombine.high %v1986_v49, %v2002_v16  ;;  %v1051_v49 = vcombine.high %v3658_v36, %v4734_v42  ;;  %v2884_v40 = vpack.i.bf16 %v1050_v27, %v581_v10 }
  0xbe   : > { %2860 = vrot.lane.b32.xlu0 %v2859_v22, %s3134_s30  ;;  %v3812_v22 = vrot.slane %v1445_v4, %v3277_v35  ;;  %v582_v16 = vcombine.high %v3665_v43, %v4734_v42  ;;  %v3841_v36 = vrot.slane %v1764_v61, %v3277_v35  ;;  %v3846_v10 = vrot.slane %v1748_v3, %v3277_v35 }
  0xbf   : > { %2890 = vrot.lane.b32.xlu1 %v2889_v41, %s3135_s6  ;;  %v3798_v25 = vpop.permute.xlu1 %1890  ;;  %v3800_v50 = vpop.permute.xlu0 %1886  ;;  %v3809_v41 = vrot.slane %v1461_v17, %v3277_v35  ;;  %v3833_v17 = vrot.slane %v2010_v33, %v3519_v44  ;;  %v3838_v30 = vrot.slane %v2011_v60, %v3519_v44  ;;  %v3855_v60 = vrot.slane %v1546_v37, %v3519_v44 }
  0xc0   : > { %v3858_v61 = vrot.slane %v1545_v18, %v3519_v44  ;;  %v2904_v3 = vpack.i.bf16 %v1051_v49, %v582_v16  ;;  %v565_v37 = vcombine.high %v3578_v57, %v3575_v58  ;;  %v1780_v16 = vcombine.low %v3846_v10, %v3841_v36 }
  0xc1   : > { %4747 = vst [vmem:[#allocation17_spill] sm:$0xff] %v3833_v17  ;;  %v405_v57 = vcombine.high %v3698_v7, %v4734_v42 }
  0xc2   : > { %2880 = vrot.lane.b32.xlu0 %v2879_v9, %s3134_s30  ;;  %v1477_v9 = vcombine.low %v3812_v22, %v3809_v41  ;;  %4750 = vst [vmem:[#allocation20_spill] sm:$0xff] %v3858_v61  ;;  %v1577_v49 = vcombine.high %v3858_v61, %v4734_v42  ;;  %v880_v61 = vcombine.high %v3705_v45, %v4734_v42 }
  0xc3   : > { %2895 = vrot.lane.b32.xlu1 %v2894_v15, %s3137_s8  ;;  %v3820_v62 = vpop.permute.xlu1 %1898  ;;  %v3822_v38 = vpop.permute.xlu0 %1894  ;;  %v579_v45 = vrot.slane %v565_v37, %v3519_v44  ;;  %v1120_v37 = vcombine.high %v3721_v19, %v4734_v42 }
  0xc4   : > { %v1926_v4 = vcombine.low %v3798_v25, %v3820_v62  ;;  %v1910_v63 = vcombine.low %v3800_v50, %v3822_v38  ;;  %v3861_v33 = vrot.slane %v1477_v9, %v3519_v44 }
  0xc6   : > { %v1934_v15 = vrot.slane %v1926_v4, %v3277_v35  ;;  %v1918_v27 = vrot.slane %v1910_v63, %v3277_v35  ;;  %2885 = vrot.lane.b32.xlu0 %v2884_v40, %s3135_s6  ;;  %4751 = vst [vmem:[#allocation21_spill] sm:$0xff] %v3861_v33  ;;  %v2909_v4 = vpack.i.bf16 %v3838_v30, %v3855_v60 }
  0xc7   : > { %2900 = vrot.lane.b32.xlu1 %v2899_v24, %s3135_s6  ;;  %v3850_v43 = vpop.permute.xlu1 %1197  ;;  %v3852_v39 = vpop.permute.xlu0 %1193  ;;  %v2042_v63 = vcombine.high %v3833_v17, %v4734_v42  ;;  %v1696_v17 = vcombine.low %v3465_v5, %v3477_v20 }
  0xc8   : > { %4748 = vst [vmem:[#allocation18_spill] sm:$0xff] %v3850_v43  ;;  %4749 = vst [vmem:[#allocation19_spill] sm:$0xff] %v3852_v39  ;;  %v1942_v11 = vcombine.low %v1918_v27, %v1934_v15 }
  0xca   : > { %v3868_v40 = vrot.slane %v1942_v11, %v3519_v44  ;;  %2910 = vrot.lane.b32.xlu0 %v2909_v4, %s3132_s28  ;;  %v2914_v11 = vpack.i.bf16 %v2042_v63, %v1577_v49 }
  0xcb   : > { %2905 = vrot.lane.b32.xlu1 %v2904_v3, %s3137_s8  ;;  %v3874_v18 = vpop.permute.xlu1 %1205  ;;  %v3876_v9 = vpop.permute.xlu0 %1201  ;;  %v1509_v3 = vcombine.high %v3861_v33, %v4734_v42 }
  0xcc   : > { %4752 = vst [vmem:[#allocation22_spill] sm:$0xff] %v3868_v40  ;;  %v1299_v24 = vcombine.low %v3850_v43, %v3874_v18  ;;  %v1283_v58 = vcombine.low %v3852_v39, %v3876_v9  ;;  %v1974_v4 = vcombine.high %v3868_v40, %v4734_v42  ;;  %v1680_v43 = vcombine.low %v3468_v23, %v3480_v21 }
  0xcd   : > { %v4753_v40 = vcombine.high %v3336_v56, %v3333_v55  ;;  %v1943_v21 = vcombine.high %v1918_v27, %v1934_v15  ;;  %v1478_v15 = vcombine.high %v3812_v22, %v3809_v41 }
  0xce   : > { %v3899_v39 = vrot.slane %v1299_v24, %v3277_v35  ;;  %v3902_v7 = vrot.slane %v1283_v58, %v3277_v35  ;;  %2915 = vrot.lane.b32.xlu0 %v2914_v11, %s3134_s30  ;;  %v2924_v33 = vpack.i.bf16 %v1974_v4, %v1509_v3  ;;  %v3915_v24 = vrot.slane %v1780_v16, %v3519_v44 }
  0xcf   : > { %v3905_v63 = vpop.permute.xlu1 %1195  ;;  %v3907_v49 = vpop.permute.xlu0 %1191  ;;  %v1048_v23 = vrot.slane %v4753_v40, %v3519_v44  ;;  %v2919_v11 = vpack.i.bf16 %v880_v61, %v405_v57  ;;  %v651_v3 = vcombine.high %v3737_v51, %v4734_v42  ;;  %v3925_v4 = vrot.slane %v1696_v17, %v3277_v35 }
  0xd0   : > { %v1315_v58 = vcombine.low %v3902_v7, %v3899_v39  ;;  %2925 = vrot.lane.b32.xlu1 %v2924_v33, %s3134_s30  ;;  %v3928_v55 = vrot.slane %v1680_v43, %v3277_v35  ;;  %v1812_v19 = vcombine.high %v3915_v24, %v4734_v42  ;;  %v1957_v22 = vrot.slane %v1943_v21, %v3519_v44 }
  0xd1   : > { %v2929_v61 = vpack.i.bf16 %v1048_v23, %v579_v45  ;;  %v2934_v33 = vpack.i.bf16 %v1120_v37, %v651_v3  ;;  %v1492_v3 = vrot.slane %v1478_v15, %v3519_v44  ;;  %v2043_v21 = vcombine.high %v3838_v30, %v4734_v42 }
  0xd2   : > { %v3931_v56 = vrot.slane %v1315_v58, %v3519_v44  ;;  %2920 = vrot.lane.b32.xlu0 %v2919_v11, %s3137_s8  ;;  %v1712_v57 = vcombine.low %v3928_v55, %v3925_v4  ;;  %v863_v58 = vcombine.high %v3639_v0, %v3636_v28  ;;  %v1995_v37 = vcombine.high %v3684_v29, %v3709_v47 }
  0xd3   : > { %v3936_v27 = vpop.permute.xlu1 %1203  ;;  %v3938_v51 = vpop.permute.xlu0 %1199  ;;  %v2944_v28 = vpack.i.bf16 %v1957_v22, %v1492_v3  ;;  %v1578_v0 = vcombine.high %v3855_v60, %v4734_v42  ;;  %v337_v15 = vcombine.high %v3612_v53, %v4734_v42  ;;  %v812_v30 = vcombine.high %v3644_v6, %v4734_v42 }
  0xd4   : > { %v1231_v17 = vcombine.low %v3905_v63, %v3936_v27  ;;  %v1215_v43 = vcombine.low %v3907_v49, %v3938_v51  ;;  %2930 = vrot.lane.b32.xlu1 %v2929_v61, %s3136_s7  ;;  %v1347_v41 = vcombine.high %v3931_v56, %v4734_v42  ;;  %v1979_v61 = vcombine.high %v3686_v59, %v3711_v48 }
  0xd5   : > { %v1530_v29 = vcombine.high %v3604_v46, %v3650_v1  ;;  %v1514_v59 = vcombine.high %v3606_v32, %v3652_v8  ;;  %v4754_v47 = vcombine.high %v3401_v31, %v3404_v34  ;;  %v2949_v53 = vpack.i.bf16 %v2043_v21, %v1578_v0 }
  0xd6   : > { %v3951_v40 = vrot.slane %v1231_v17, %v3277_v35  ;;  %v3954_v16 = vrot.slane %v1215_v43, %v3277_v35  ;;  %2935 = vrot.lane.b32.xlu0 %v2934_v33, %s3138_s9  ;;  %v2939_v11 = vpack.i.bf16 %v1812_v19, %v1347_v41  ;;  %v877_v60 = vrot.slane %v863_v58, %v3519_v44  ;;  %v4755_v58 = vld [vmem:[#allocation6_spill] sm:$0xff] }
  0xd7   : > { %v402_v48 = vrot.slane %v4754_v47, %v3519_v44  ;;  %v3991_v6 = vrot.slane %v1712_v57, %v3519_v44  ;;  %v3994_v46 = vrot.slane %v1995_v37, %v3277_v35  ;;  %v3997_v32 = vrot.slane %v1979_v61, %v3277_v35 }
  0xd8   : > { %v1247_v17 = vcombine.low %v3954_v16, %v3951_v40  ;;  %2940 = vrot.lane.b32.xlu1 %v2939_v11, %s3134_s30  ;;  %v1052_v31 = vcombine.high %v1048_v23, %v4734_v42  ;;  %v1316_v34 = vcombine.high %v3902_v7, %v3899_v39  ;;  %v2954_v1 = vpack.i.bf16 %v812_v30, %v337_v15  ;;  %v4756_v11 = vld [vmem:[#allocation7_spill] sm:$0xff] }
  0xd9   : > { %v583_v8 = vcombine.high %v579_v45, %v4734_v42  ;;  %v1781_v43 = vcombine.high %v3846_v10, %v3841_v36  ;;  %v4007_v33 = vrot.slane %v1530_v29, %v3277_v35  ;;  %v4010_v41 = vrot.slane %v1514_v59, %v3277_v35  ;;  %v4757_v29 = vld [vmem:[#allocation14_spill] sm:$0xff] }
  0xda   : > { %v3986_v19 = vrot.slane %v1247_v17, %v3519_v44  ;;  %2945 = vrot.lane.b32.xlu0 %v2944_v28, %s3132_s28  ;;  %v2959_v23 = vpack.i.bf16 %v877_v60, %v402_v48  ;;  %v1744_v7 = vcombine.high %v3991_v6, %v4734_v42  ;;  %v2026_v45 = vcombine.low %v3997_v32, %v3994_v46 }
  0xdb   : > { %v2964_v36 = vpack.i.bf16 %v1052_v31, %v583_v8  ;;  %v1330_v10 = vrot.slane %v1316_v34, %v3519_v44  ;;  %v1795_v57 = vrot.slane %v1781_v43, %v3519_v44  ;;  %v795_v21 = vcombine.high %v4756_v11, %v4755_v58 }
  0xdc   : > { %2950 = vrot.lane.b32.xlu1 %v2949_v53, %s3135_s6  ;;  %v1279_v39 = vcombine.high %v3986_v19, %v4734_v42  ;;  %v1561_v37 = vcombine.low %v4010_v41, %v4007_v33  ;;  %v1927_v61 = vcombine.high %v3798_v25, %v3820_v62  ;;  %v1911_v17 = vcombine.high %v3800_v50, %v3822_v38  ;;  %v4758_v62 = vld [vmem:[#allocation2_spill] sm:$0xff]  ;;  %v4759_v38 = vld [vmem:[#allocation3_spill] sm:$0xff] }
  0xdd   : > { %v1975_v0 = vcombine.high %v1957_v22, %v4734_v42  ;;  %v2034_v15 = vrot.slane %v2026_v45, %v3519_v44  ;;  %v1462_v30 = vcombine.high %v3741_v52, %v3776_v26  ;;  %v1446_v59 = vcombine.high %v4757_v29, %v3778_v54 }
  0xde   : > { %2955 = vrot.lane.b32.xlu0 %v2954_v1, %s3137_s8  ;;  %v2969_v28 = vpack.i.bf16 %v1744_v7, %v1279_v39  ;;  %v2974_v47 = vpack.i.bf16 %v1795_v57, %v1330_v10  ;;  %v1510_v25 = vcombine.high %v1492_v3, %v4734_v42  ;;  %v1569_v50 = vrot.slane %v1561_v37, %v3519_v44  ;;  %v4761_v7 = vld [vmem:[#allocation18_spill] sm:$0xff] }
  0xdf   : > { %v4760_v53 = vcombine.high %v4758_v62, %v4759_v38  ;;  %v809_v31 = vrot.slane %v795_v21, %v3519_v44  ;;  %v1713_v52 = vcombine.high %v3928_v55, %v3925_v4  ;;  %v4048_v26 = vrot.slane %v1927_v61, %v3277_v35  ;;  %v4124_v38 = vpop.permute.xlu0 %2118 }
  0xe0   : > { %2960 = vrot.lane.b32.xlu1 %v2959_v23, %s3136_s7  ;;  %v4051_v54 = vrot.slane %v1911_v17, %v3277_v35  ;;  %v1248_v3 = vcombine.high %v3954_v16, %v3951_v40  ;;  %v2979_v34 = vpack.i.bf16 %v1975_v0, %v1510_v25  ;;  %v406_v1 = vcombine.high %v402_v48, %v4734_v42  ;;  %v4764_v17 = vld [vmem:[#allocation4_spill] sm:$0xff] }
  0xe1   : > { %v334_v22 = vrot.slane %v4760_v53, %v3519_v44  ;;  %v4058_v8 = vrot.slane %v1462_v30, %v3277_v35  ;;  %v4061_v43 = vrot.slane %v1446_v59, %v3277_v35  ;;  %v2984_v4 = vpack.i.bf16 %v2034_v15, %v1569_v50 }
  0xe2   : > { %2965 = vrot.lane.b32.xlu0 %v2964_v36, %s3138_s9  ;;  %v881_v55 = vcombine.high %v877_v60, %v4734_v42  ;;  %v1765_v23 = vcombine.high %v3433_v12, %v3445_v2  ;;  %v1749_v40 = vcombine.high %v3436_v13, %v3448_v14  ;;  %v1727_v48 = vrot.slane %v1713_v52, %v3519_v44  ;;  %v4762_v36 = vld [vmem:[#allocation19_spill] sm:$0xff] }
  0xe3   : > { %v2989_v16 = vpack.i.bf16 %v809_v31, %v334_v22  ;;  %v1958_v39 = vcombine.low %v4051_v54, %v4048_v26  ;;  %v1300_v45 = vcombine.high %v4761_v7, %v3874_v18  ;;  %v1284_v58 = vcombine.high %v4762_v36, %v3876_v9 }
  0xe4   : > { %2970 = vrot.lane.b32.xlu1 %v2969_v28, %s3134_s30  ;;  %v1262_v60 = vrot.slane %v1248_v3, %v3519_v44  ;;  %v1493_v12 = vcombine.low %v4061_v43, %v4058_v8  ;;  %v2994_v13 = vpack.i.bf16 %v881_v55, %v406_v1  ;;  %v1348_v2 = vcombine.high %v1330_v10, %v4734_v42 }
  0xe5   : > { %v1813_v14 = vcombine.high %v1795_v57, %v4734_v42  ;;  %v4084_v11 = vrot.slane %v1765_v23, %v3277_v35  ;;  %v4087_v18 = vrot.slane %v1749_v40, %v3277_v35  ;;  %v4090_v9 = vrot.slane %v1300_v45, %v3277_v35  ;;  %v4763_v57 = vld [vmem:[#allocation5_spill] sm:$0xff] }
  0xe6   : > { %2975 = vrot.lane.b32.xlu0 %v2974_v47, %s3132_s28  ;;  %v4093_v21 = vrot.slane %v1284_v58, %v3277_v35  ;;  %v2999_v37 = vpack.i.bf16 %v1727_v48, %v1262_v60  ;;  %v1966_v61 = vrot.slane %v1958_v39, %v3519_v44  ;;  %v1697_v10 = vcombine.high %v3465_v5, %v3477_v20  ;;  %v4111_v20 = vpop.permute.xlu1 %2122 }
  0xe7   : > { %v1681_v28 = vcombine.high %v4764_v17, %v4763_v57  ;;  %v2044_v0 = vcombine.high %v2034_v15, %v4734_v42  ;;  %v1232_v30 = vcombine.high %v3905_v63, %v3936_v27  ;;  %v1216_v29 = vcombine.high %v3907_v49, %v3938_v51 }
  0xe8   : > { %2980 = vrot.lane.b32.xlu1 %v2979_v34, %s3135_s6  ;;  %v3004_v59 = vpack.i.bf16 %v1813_v14, %v1348_v2  ;;  %v1501_v47 = vrot.slane %v1493_v12, %v3519_v44  ;;  %v338_v25 = vcombine.high %v334_v22, %v4734_v42  ;;  %v1796_v5 = vcombine.low %v4087_v18, %v4084_v11 }
  0xe9   : > { %v1331_v15 = vcombine.low %v4093_v21, %v4090_v9  ;;  %v1579_v49 = vcombine.high %v1569_v50, %v4734_v42  ;;  %v813_v27 = vcombine.high %v809_v31, %v4734_v42  ;;  %v4119_v51 = vrot.slane %v1697_v10, %v3277_v35 }
  0xea   : > { %2985 = vrot.lane.b32.xlu0 %v2984_v4, %s3133_s29  ;;  %v3009_v63 = vpack.i.bf16 %v1966_v61, %v1501_v47  ;;  %v4122_v62 = vrot.slane %v1681_v28, %v3277_v35  ;;  %v1745_v53 = vcombine.high %v1727_v48, %v4734_v42  ;;  %v4128_v22 = vrot.slane %v1232_v30, %v3277_v35  ;;  %v4140_v55 = vpop.permute.xlu1 %2130  ;;  %v4150_v48 = vpop.permute.xlu0 %2126 }
  0xeb   : > { %v4131_v52 = vrot.slane %v1216_v29, %v3277_v35  ;;  %v3014_v50 = vpack.i.bf16 %v2044_v0, %v1579_v49  ;;  %v1280_v31 = vcombine.high %v1262_v60, %v4734_v42  ;;  %v2027_v3 = vcombine.high %v3997_v32, %v3994_v46 }
  0xec   : > { %2990 = vrot.lane.b32.xlu1 %v2989_v16, %s3136_s7  ;;  %v3019_v34 = vpack.i.bf16 %v813_v27, %v338_v25  ;;  %v1339_v1 = vrot.slane %v1331_v15, %v3519_v44  ;;  %v1804_v4 = vrot.slane %v1796_v5, %v3519_v44  ;;  %v1728_v23 = vcombine.low %v4122_v62, %v4119_v51 }
  0xed   : > { %v1562_v40 = vcombine.high %v4010_v41, %v4007_v33  ;;  %v1263_v16 = vcombine.low %v4131_v52, %v4128_v22  ;;  %v3024_v46 = vpack.i.bf16 %v1745_v53, %v1280_v31  ;;  %v1976_v32 = vcombine.high %v1966_v61, %v4734_v42 }
  0xee   : > { %2995 = vrot.lane.b32.xlu0 %v2994_v13, %s3138_s9  ;;  %v3029_v39 = vpack.i.bf16 %v1804_v4, %v1339_v1  ;;  %v1511_v7 = vcombine.high %v1501_v47, %v4734_v42  ;;  %v2041_v45 = vrot.slane %v2027_v3, %v3519_v44  ;;  %v1736_v36 = vrot.slane %v1728_v23, %v3519_v44  ;;  %v4161_v12 = vpop.permute.xlu1 %2120 }
  0xef   : > { %v1959_v33 = vcombine.high %v4051_v54, %v4048_v26  ;;  %v1576_v58 = vrot.slane %v1562_v40, %v3519_v44  ;;  %v1271_v60 = vrot.slane %v1263_v16, %v3519_v44  ;;  %v1494_v13 = vcombine.high %v4061_v43, %v4058_v8  ;;  %v4168_v26 = vpop.permute.xlu0 %2116 }
  0xf0   : > { %3000 = vrot.lane.b32.xlu1 %v2999_v37, %s3132_s28  ;;  %v3034_v41 = vpack.i.bf16 %v1976_v32, %v1511_v7  ;;  %v1349_v14 = vcombine.high %v1339_v1, %v4734_v42  ;;  %v1814_v37 = vcombine.high %v1804_v4, %v4734_v42  ;;  %v2045_v10 = vcombine.high %v2041_v45, %v4734_v42 }
  0xf1   : > { %v3039_v2 = vpack.i.bf16 %v2041_v45, %v1576_v58  ;;  %v3044_v54 = vpack.i.bf16 %v1736_v36, %v1271_v60  ;;  %v1973_v61 = vrot.slane %v1959_v33, %v3519_v44  ;;  %v1797_v57 = vcombine.high %v4087_v18, %v4084_v11 }
  0xf2   : > { %3005 = vrot.lane.b32.xlu0 %v3004_v59, %s3135_s6  ;;  %v1332_v8 = vcombine.high %v4093_v21, %v4090_v9  ;;  %v3049_v43 = vpack.i.bf16 %v1814_v37, %v1349_v14  ;;  %v1508_v17 = vrot.slane %v1494_v13, %v3519_v44  ;;  %v1746_v28 = vcombine.high %v1736_v36, %v4734_v42  ;;  %v2129_v30 = vpop.permute.xlu1 %2128 }
  0xf3   : > { %v1580_v0 = vcombine.high %v1576_v58, %v4734_v42  ;;  %v2208_v29 = vcombine.low %v4124_v38, %v4150_v48  ;;  %v2224_v59 = vcombine.low %v4111_v20, %v4140_v55  ;;  %v1281_v11 = vcombine.high %v1271_v60, %v4734_v42  ;;  %v2125_v9 = vpop.permute.xlu0 %2124 }
  0xf4   : > { %3010 = vrot.lane.b32.xlu1 %v3009_v63, %s3133_s29  ;;  %v3054_v18 = vpack.i.bf16 %v1973_v61, %v1508_v17  ;;  %v1811_v47 = vrot.slane %v1797_v57, %v3519_v44  ;;  %v1729_v25 = vcombine.high %v4122_v62, %v4119_v51  ;;  %v1346_v5 = vrot.slane %v1332_v8, %v3519_v44 }
  0xf5   : > { %v3059_v21 = vpack.i.bf16 %v2045_v10, %v1580_v0  ;;  %v1264_v15 = vcombine.high %v4131_v52, %v4128_v22  ;;  %v2140_v63 = vcombine.low %v4168_v26, %v2125_v9  ;;  %v2156_v49 = vcombine.low %v4161_v12, %v2129_v30 }
  0xf6   : > { %3015 = vrot.lane.b32.xlu0 %v3014_v50, %s3137_s8  ;;  %v2216_v27 = vrot.slane %v2208_v29, %v3277_v35  ;;  %v2232_v53 = vrot.slane %v2224_v59, %v3277_v35  ;;  %v1977_v50 = vcombine.high %v1973_v61, %v4734_v42  ;;  %v3064_v51 = vpack.i.bf16 %v1746_v28, %v1281_v11 }
  0xf7   : > { %v1512_v62 = vcombine.high %v1508_v17, %v4734_v42  ;;  %v1743_v31 = vrot.slane %v1729_v25, %v3519_v44  ;;  %v1278_v22 = vrot.slane %v1264_v15, %v3519_v44  ;;  %v2148_v52 = vrot.slane %v2140_v63, %v3277_v35  ;;  %v2486_v25 = vld [vmem:[%s4698_s3 + $0x88] sm:$0xff] }
  0xf8   : > { %3020 = vrot.lane.b32.xlu1 %v3019_v34, %s3138_s9  ;;  %v2164_v3 = vrot.slane %v2156_v49, %v3277_v35  ;;  %v3069_v34 = vpack.i.bf16 %v1811_v47, %v1346_v5  ;;  %v2240_v1 = vcombine.low %v2216_v27, %v2232_v53  ;;  %v1350_v23 = vcombine.high %v1346_v5, %v4734_v42  ;;  %v2469_v49 = vld [vmem:[%s4698_s3] sm:$0xff] }
  0xf9   : > { %v3074_v4 = vpack.i.bf16 %v1977_v50, %v1512_v62  ;;  %v1815_v40 = vcombine.high %v1811_v47, %v4734_v42  ;;  %v1282_v32 = vcombine.high %v1278_v22, %v4734_v42  ;;  %v2225_v58 = vcombine.high %v4111_v20, %v4140_v55  ;;  %v2485_v47 = vld [vmem:[%s4698_s3 + $0x80] sm:$0xff]  ;;  %v2488_v62 = vld [vmem:[%s4698_s3 + $0x98] sm:$0xff] }
  0xfa   : > { %3025 = vrot.lane.b32.xlu0 %v3024_v46, %s3135_s6  ;;  %v2172_v16 = vcombine.low %v2148_v52, %v2164_v3  ;;  %v3079_v46 = vpack.i.bf16 %v1743_v31, %v1278_v22  ;;  %v4213_v7 = vrot.slane %v2240_v1, %v3519_v44  ;;  %v2241_v60 = vcombine.high %v2216_v27, %v2232_v53  ;;  %v2470_v27 = vld [vmem:[%s4698_s3 + $0x8] sm:$0xff]  ;;  %v2487_v53 = vld [vmem:[%s4698_s3 + $0x90] sm:$0xff]  ;;  %v2472_v22 = vld [vmem:[%s4698_s3 + $0x18] sm:$0xff] }
  0xfb   : > { %v3084_v45 = vpack.i.bf16 %v1815_v40, %v1350_v23  ;;  %v2157_v14 = vcombine.high %v4161_v12, %v2129_v30  ;;  %v2173_v37 = vcombine.high %v2148_v52, %v2164_v3  ;;  %v2239_v20 = vrot.slane %v2225_v58, %v3277_v35  ;;  %v2490_v23 = vld [vmem:[%s4698_s3 + $0xa8] sm:$0xff] }
  0xfc   : > { %3030 = vrot.lane.b32.xlu1 %v3029_v39, %s3133_s29  ;;  %v1747_v39 = vcombine.high %v1743_v31, %v4734_v42  ;;  %v4217_v36 = vrot.slane %v2172_v16, %v3519_v44  ;;  %v2272_v13 = vcombine.high %v4213_v7, %v4734_v42  ;;  %v2744_v63 = vpack.c.bf16 %v2486_v25, %v2485_v47  ;;  %v2471_v31 = vld [vmem:[%s4698_s3 + $0x10] sm:$0xff] }
  0xfd   : > { %v2171_v61 = vrot.slane %v2157_v14, %v3277_v35  ;;  %v2187_v10 = vrot.slane %v2173_v37, %v3519_v44  ;;  %v3139_v50 = vmov 0   ;;  %v2748_v1 = vpack.c.bf16 %v2488_v62, %v2487_v53  ;;  %v2475_v14 = vld [vmem:[%s4698_s3 + $0x30] sm:$0xff]  ;;  %v2476_v37 = vld [vmem:[%s4698_s3 + $0x38] sm:$0xff] }
  0xfe   : > { %3035 = vrot.lane.b32.xlu0 %v3034_v41, %s3137_s8  ;;  %v3089_v33 = vpack.i.bf16 %v1747_v39, %v1282_v32  ;;  %v2209_v41 = vcombine.high %v4124_v38, %v4150_v48  ;;  %2745 = vmatprep.subr.bf16.mxu1 %v2744_v63  ;;  %v2750_v16 = vpack.c.bf16 %v2472_v22, %v2471_v31  ;;  %v2473_v32 = vld [vmem:[%s4698_s3 + $0x20] sm:$0xff]  ;;  %v2474_v39 = vld [vmem:[%s4698_s3 + $0x28] sm:$0xff]  ;;  %v2480_v53 = vld [vmem:[%s4698_s3 + $0x58] sm:$0xff] }
  0xff   : > { %v2205_v0 = vcombine.high %v2187_v10, %v4734_v42  ;;  %3094 = vset.pattern.permute.xlu0 %v3139_v50  ;;  %v2498_v50 = vld [vmem:[%s4698_s3 + $0xe8] sm:$0xff]  ;;  %v4765_v22 = vld [vmem:[#allocation8_spill] sm:$0xff] }
 0x100   : > { %3040 = vrot.lane.b32.xlu1 %v3039_v2, %s3136_s7  ;;  %v2141_v2 = vcombine.high %v4168_v26, %v2125_v9  ;;  %v2223_v38 = vrot.slane %v2209_v41, %v3277_v35  ;;  %v2255_v26 = vrot.slane %v2241_v60, %v3519_v44  ;;  %v2754_v60 = vpack.c.bf16 %v2474_v39, %v2473_v32 }
 0x102   : > { %3045 = vrot.lane.b32.xlu0 %v3044_v54, %s3133_s29  ;;  %v2204_v54 = vcombine.high %v4217_v36, %v4734_v42  ;;  %v2155_v12 = vrot.slane %v2141_v2, %v3277_v35  ;;  %v2256_v57 = vcombine.low %v2223_v38, %v2239_v20  ;;  %v2273_v17 = vcombine.high %v2255_v26, %v4734_v42 }
 0x103   : > { %v2257_v11 = vcombine.high %v2223_v38, %v2239_v20  ;;  %v2493_v38 = vld [vmem:[%s4698_s3 + $0xc0] sm:$0xff] }
 0x104   : > { %3050 = vrot.lane.b32.xlu1 %v3049_v43, %s3137_s8  ;;  %v2188_v28 = vcombine.low %v2155_v12, %v2171_v61  ;;  %v2264_v29 = vrot.slane %v2256_v57, %v3519_v44  ;;  %v2189_v5 = vcombine.high %v2155_v12, %v2171_v61  ;;  %v2758_v12 = vpack.c.bf16 %v2476_v37, %v2475_v14  ;;  %v2478_v57 = vld [vmem:[%s4698_s3 + $0x48] sm:$0xff]  ;;  %v2481_v14 = vld [vmem:[%s4698_s3 + $0x60] sm:$0xff] }
 0x105   : > { %v2482_v37 = vld [vmem:[%s4698_s3 + $0x68] sm:$0xff] }
 0x106   : > { %3055 = vrot.lane.b32.xlu0 %v3054_v18, %s3136_s7  ;;  %v2196_v59 = vrot.slane %v2188_v28, %v3519_v44  ;;  %v2203_v40 = vrot.slane %v2189_v5, %v3519_v44  ;;  %v2496_v28 = vld [vmem:[%s4698_s3 + $0xd8] sm:$0xff] }
 0x108   : > { %3060 = vrot.lane.b32.xlu1 %v3059_v21, %s3138_s9  ;;  %v4234_v55 = vpop.permute.xlu0 %2815  ;;  %v2274_v21 = vcombine.high %v2264_v29, %v4734_v42  ;;  %v2206_v15 = vcombine.high %v2196_v59, %v4734_v42 }
 0x10a   : > { %3065 = vrot.lane.b32.xlu0 %v3064_v51, %s3137_s8  ;;  %v2746_v51 = vpack.c.bf16 %v2470_v27, %v2469_v49 }
 0x10c   : > { %3070 = vrot.lane.b32.xlu1 %v3069_v34, %s3136_s7  ;;  %v2271_v34 = vrot.slane %v2257_v11, %v3519_v44  ;;  %2747 = vmatpush3.bf16.msra.mxu1 %v2746_v51 }
 0x10d   : > { %2749 = vmatprep.subr.bf16.mxu1 %v2748_v1  ;;  %v4766_v1 = vld [vmem:[#allocation9_spill] sm:$0xff] }
 0x10e   : > { %3075 = vrot.lane.b32.xlu0 %v3074_v4, %s3138_s9  ;;  %v2489_v4 = vld [vmem:[%s4698_s3 + $0xa0] sm:$0xff]  ;;  %v2275_v58 = vcombine.high %v2271_v34, %v4734_v42 }
 0x110   : > { %3080 = vrot.lane.b32.xlu1 %v3079_v46, %s3136_s7  ;;  %v4244_v8 = vpop.permute.xlu0 %2820  ;;  %v2752_v46 = vpack.c.bf16 %v2490_v23, %v2489_v4  ;;  %2751 = vmatpush3.bf16.msra.mxu1 %v2750_v16  ;;  %v4767_v23 = vld [vmem:[#allocation16_spill] sm:$0xff]  ;;  %v4768_v16 = vld [vmem:[#allocation15_spill] sm:$0xff] }
 0x111   : > { %v2822_v47 = vunpack.i.l.bf16 %v4244_v8 }
 0x112   : > { %3085 = vrot.lane.b32.xlu0 %v3084_v45, %s3138_s9  ;;  %v2491_v45 = vld [vmem:[%s4698_s3 + $0xb0] sm:$0xff]  ;;  %2753 = vmatprep.subr.bf16.mxu1 %v2752_v46 }
 0x114   : > { %3090 = vrot.lane.b32.xlu1 %v3089_v33, %s3138_s9  ;;  %v2492_v33 = vld [vmem:[%s4698_s3 + $0xb8] sm:$0xff]  ;;  %2755 = vmatpush3.bf16.msra.mxu1 %v2754_v60 }
 0x115   : > { %v2756_v2 = vpack.c.bf16 %v2492_v33, %v2491_v45 }
 0x116   : > { %2305 = vrot.lane.b32.xlu0 %v2272_v13, %s3134_s30  ;;  %v2207_v13 = vcombine.high %v2203_v40, %v4734_v42  ;;  %v2494_v42 = vld [vmem:[%s4698_s3 + $0xc8] sm:$0xff] }
 0x117   : > { %2757 = vmatprep.subr.bf16.mxu1 %v2756_v2  ;;  %v2760_v61 = vpack.c.bf16 %v2494_v42, %v2493_v38 }
 0x118   : > { %2277 = vrot.lane.b32.xlu1 %v2204_v54, %s3134_s30  ;;  %v2380_v54 = vld [vmem:[%s4697_s2] sm:$0xff]  ;;  %2759 = vmatpush3.bf16.msra.mxu1 %v2758_v12 }
 0x119   : > { %v4236_v48 = vpop.permute.xlu1 %2825  ;;  %2761 = vmatprep.subr.bf16.mxu1 %v2760_v61 }
 0x11a   : > { %2309 = vrot.lane.b32.xlu0 %v2255_v26, %s3132_s28 }
 0x11c   : > { %2281 = vrot.lane.b32.xlu1 %v2187_v10, %s3132_s28  ;;  %v2477_v10 = vld [vmem:[%s4698_s3 + $0x40] sm:$0xff] }
 0x11d   : > { %v4246_v43 = vpop.permute.xlu1 %2830  ;;  %v2762_v5 = vpack.c.bf16 %v2478_v57, %v2477_v10 }
 0x11e   : > { %2313 = vrot.lane.b32.xlu0 %v2273_v17, %s3135_s6  ;;  %v2495_v17 = vld [vmem:[%s4698_s3 + $0xd0] sm:$0xff] }
 0x11f   : > { %v2764_v27 = vpack.c.bf16 %v2496_v28, %v2495_v17  ;;  %2763 = vmatpush3.bf16.msra.mxu1 %v2762_v5 }
 0x120   : > { %v4254_v35 = vpop.permute.xlu0 %2835  ;;  %2285 = vrot.lane.b32.xlu1 %v2205_v0, %s3135_s6 }
 0x121   : > { %v4252_v30 = vpop.permute.xlu1 %2855  ;;  %v2838_v51 = vunpack.i.h.bf16 %v4254_v35  ;;  %2765 = vmatprep.subr.bf16.mxu1 %v2764_v27 }
 0x122   : > { %2317 = vrot.lane.b32.xlu0 %v2264_v29, %s3133_s29  ;;  %v2858_v25 = vunpack.i.h.bf16 %v4252_v30  ;;  %v2857_v63 = vunpack.i.l.bf16 %v4252_v30  ;;  %v2837_v30 = vunpack.i.l.bf16 %v4254_v35 }
 0x124   : > { %v4262_v9 = vpop.permute.xlu0 %2840  ;;  %2289 = vrot.lane.b32.xlu1 %v2196_v59, %s3133_s29 }
 0x125   : > { %v4260_v18 = vpop.permute.xlu1 %2865  ;;  %v2843_v62 = vunpack.i.h.bf16 %v4262_v9  ;;  %v2842_v31 = vunpack.i.l.bf16 %v4262_v9 }
 0x126   : > { %2321 = vrot.lane.b32.xlu0 %v2274_v21, %s3137_s8  ;;  %v2868_v0 = vunpack.i.h.bf16 %v4260_v18  ;;  %v2867_v29 = vunpack.i.l.bf16 %v4260_v18  ;;  %v2823_v21 = vunpack.i.h.bf16 %v4244_v8  ;;  %v2497_v8 = vld [vmem:[%s4698_s3 + $0xe0] sm:$0xff] }
 0x128   : > { %v4294_v3 = vpop.permute.xlu0 %2845  ;;  %2293 = vrot.lane.b32.xlu1 %v2206_v15, %s3137_s8  ;;  %v2479_v15 = vld [vmem:[%s4698_s3 + $0x50] sm:$0xff]  ;;  %v708_v4 = vsel %vm463_vm2, %v4766_v1, %v2867_v29 }
 0x129   : > { %v4292_v52 = vpop.permute.xlu1 %2870  ;;  %v2766_v33 = vpack.c.bf16 %v2480_v53, %v2479_v15  ;;  %v709_v42 = vsel %vm465_vm3, %v708_v4, %v2822_v47 }
 0x12a   : > { %2325 = vrot.lane.b32.xlu0 %v2271_v34, %s3136_s7  ;;  %v1177_v34 = vsel %vm463_vm2, %v4765_v22, %v2868_v0  ;;  %v2817_v22 = vunpack.i.l.bf16 %v4234_v55 }
 0x12b   : > { %v1178_v12 = vsel %vm465_vm3, %v1177_v34, %v2823_v21  ;;  %2767 = vmatpush3.bf16.msra.mxu1 %v2766_v33 }
 0x12c   : > { %v4320_v41 = vpop.permute.xlu0 %2850  ;;  %2297 = vrot.lane.b32.xlu1 %v2203_v40, %s3136_s7  ;;  %s258_s7 = scalar_lea.vmem %s4700_s5, %s2694_s25 }
 0x12d   : > { %v4318_v44 = vpop.permute.xlu1 %2875 }
 0x12e   : > { %2329 = vrot.lane.b32.xlu0 %v2275_v58, %s3138_s9  ;;  %v2768_v58 = vpack.c.bf16 %v2498_v50, %v2497_v8  ;;  %v4769_v50 = vld [vmem:[#allocation13_spill] sm:$0xff] }
 0x130   : > { %v4343_v26 = vpop.permute.xlu0 %2860  ;;  %2301 = vrot.lane.b32.xlu1 %v2207_v13, %s3138_s9  ;;  %2769 = vmatprep.subr.bf16.mxu1 %v2768_v58 }
 0x131   : > { %v4341_v20 = vpop.permute.xlu1 %2890  ;;  %v2862_v27 = vunpack.i.l.bf16 %v4343_v26 }
 0x132   : > { %2383 = vperm.xlu0 %3094, %v2380_v54  }
 0x134   : > { %v2881_v11 = vpop.permute.xlu0 %2880 }
 0x135   : > { %v4360_v59 = vpop.permute.xlu1 %2895  ;;  %v2883_v18 = vunpack.i.h.bf16 %v2881_v11  ;;  %v2882_v49 = vunpack.i.l.bf16 %v2881_v11  ;;  %v2770_v11 = vpack.c.bf16 %v2482_v37, %v2481_v14  ;;  %v4772_v14 = vld [vmem:[#allocation10_spill] sm:$0xff]  ;;  %v2893_v37 = vunpack.i.h.bf16 %v4341_v20 }
 0x136   : > { %v2898_v58 = vunpack.i.h.bf16 %v4360_v59 }
 0x137   : > { %v938_v40 = vsel %vm463_vm2, %v4767_v23, %v2883_v18  ;;  %v464_v46 = vsel %vm463_vm2, %v4768_v16, %v2882_v49  ;;  %2771 = vmatpush3.bf16.msra.mxu1 %v2770_v11  ;;  %v2863_v49 = vunpack.i.h.bf16 %v4343_v26  ;;  %v2878_v23 = vunpack.i.h.bf16 %v4318_v44 }
 0x138   : > { %v2886_v39 = vpop.permute.xlu0 %2885  ;;  %v466_v9 = vsel %vm465_vm3, %v464_v46, %v2837_v30  ;;  %v939_v60 = vsel %vm465_vm3, %v938_v40, %v2838_v51  ;;  %v4770_v30 = vld [vmem:[#allocation12_spill] sm:$0xff]  ;;  %v2877_v40 = vunpack.i.l.bf16 %v4318_v44  ;;  %v2873_v46 = vunpack.i.h.bf16 %v4292_v52 }
 0x139   : > { %v2901_v32 = vpop.permute.xlu1 %2900  ;;  %v2888_v13 = vunpack.i.h.bf16 %v2886_v39  ;;  %v2887_v2 = vunpack.i.l.bf16 %v2886_v39  ;;  %v1184_v51 = vsel %vm463_vm2, %v4769_v50, %v2863_v49  ;;  %v2897_v44 = vunpack.i.l.bf16 %v4360_v59 }
 0x13a   : > { %v2903_v45 = vunpack.i.h.bf16 %v2901_v32  ;;  %v2902_v35 = vunpack.i.l.bf16 %v2901_v32  ;;  %v2872_v32 = vunpack.i.l.bf16 %v4292_v52  ;;  %v2828_v59 = vunpack.i.h.bf16 %v4236_v48 }
 0x13b   : > { %v1179_v61 = vsel %vm467_vm4, %v1178_v12, %v2888_v13  ;;  %v710_v10 = vsel %vm467_vm4, %v709_v42, %v2887_v2  ;;  %v4771_v13 = vld [vmem:[#allocation11_spill] sm:$0xff]  ;;  %v2848_v42 = vunpack.i.h.bf16 %v4294_v3  ;;  %v2847_v12 = vunpack.i.l.bf16 %v4294_v3 }
 0x13c   : > { %v468_v54 = vsel %vm467_vm4, %v466_v9, %v2902_v35  ;;  %v940_v38 = vsel %vm467_vm4, %v939_v60, %v2903_v45  ;;  %v4404_v57 = vpop.permute.xlu0 %2910  ;;  %v4413_v0 = vsel %vm469_vm5, %v710_v10, %v2842_v31  ;;  %v4416_v29 = vsel %vm469_vm5, %v1179_v61, %v2843_v62 }
 0x13d   : > { %v4407_v17 = vsel %vm469_vm5, %v468_v54, %v2857_v63  ;;  %v4410_v28 = vsel %vm469_vm5, %v940_v38, %v2858_v25  ;;  %v4418_v21 = vpop.permute.xlu1 %2905  ;;  %v715_v62 = vsel %vm463_vm2, %v4770_v30, %v2862_v27  ;;  %v2818_v31 = vunpack.i.h.bf16 %v4234_v55 }
 0x13e   : > { %v716_v26 = vsel %vm465_vm3, %v715_v62, %v2817_v22  ;;  %v2833_v45 = vunpack.i.h.bf16 %v4246_v43  ;;  %v2832_v35 = vunpack.i.l.bf16 %v4246_v43  ;;  %v945_v2 = vsel %vm463_vm2, %v4771_v13, %v2873_v46 }
 0x13f   : > { %v1185_v1 = vsel %vm465_vm3, %v1184_v51, %v2818_v31  ;;  %v717_v39 = vsel %vm467_vm4, %v716_v26, %v2877_v40  ;;  %v477_v43 = vsel %vm463_vm2, %v4772_v14, %v2872_v32  ;;  %v2892_v54 = vunpack.i.l.bf16 %v4341_v20 }
 0x140   : > { %v4420_v47 = vpop.permute.xlu0 %2915  ;;  %v1186_v55 = vsel %vm467_vm4, %v1185_v1, %v2878_v23  ;;  %v718_v9 = vsel %vm469_vm5, %v717_v39, %v2832_v35  ;;  %v2827_v38 = vunpack.i.l.bf16 %v4236_v48  ;;  %v2853_v50 = vunpack.i.h.bf16 %v4320_v41 }
 0x141   : > { %v1187_v60 = vsel %vm469_vm5, %v1186_v55, %v2833_v45  ;;  %v719_v10 = vsel %vm471_vm6, %v718_v9, %v2897_v44  ;;  %v2852_v20 = vunpack.i.l.bf16 %v4320_v41  ;;  %v946_v48 = vsel %vm465_vm3, %v945_v2, %v2828_v59 }
 0x142   : > { %v4422_v5 = vpop.permute.xlu1 %2925  ;;  %v1188_v11 = vsel %vm471_vm6, %v1187_v60, %v2898_v58  ;;  %v478_v51 = vsel %vm465_vm3, %v477_v43, %v2827_v38  ;;  %v947_v62 = vsel %vm467_vm4, %v946_v48, %v2893_v37  ;;  %v2908_v2 = vunpack.i.h.bf16 %v4418_v21 }
 0x143   : > { %v479_v3 = vsel %vm467_vm4, %v478_v51, %v2892_v54  ;;  %v720_v23 = vsel %vm473_vm7, %v719_v10, %v2852_v20  ;;  %v1189_v41 = vsel %vm473_vm7, %v1188_v11, %v2853_v50  ;;  %v948_v39 = vsel %vm469_vm5, %v947_v62, %v2848_v42 }
 0x144   : > { %v4424_v15 = vpop.permute.xlu0 %2920  ;;  %v480_v32 = vsel %vm469_vm5, %v479_v3, %v2847_v12  ;;  %v2907_v14 = vunpack.i.l.bf16 %v4418_v21  ;;  %v2918_v10 = vunpack.i.h.bf16 %v4420_v47  ;;  %v2917_v11 = vunpack.i.l.bf16 %v4420_v47 }
 0x145   : > { %v2923_v31 = vunpack.i.h.bf16 %v4424_v15  ;;  %v2922_v22 = vunpack.i.l.bf16 %v4424_v15  ;;  %v1181_v51 = vsel %vm471_vm6, %v4416_v29, %v2908_v2 }
 0x146   : > { %v4426_v25 = vpop.permute.xlu1 %2930 }
 0x147   : > { %v949_v45 = vsel %vm471_vm6, %v948_v39, %v2923_v31  ;;  %v481_v15 = vsel %vm471_vm6, %v480_v32, %v2922_v22  ;;  %v2933_v54 = vunpack.i.h.bf16 %v4426_v25  ;;  %v2932_v59 = vunpack.i.l.bf16 %v4426_v25 }
 0x148   : > { %v2936_v63 = vpop.permute.xlu0 %2935  ;;  %v712_v25 = vsel %vm471_vm6, %v4413_v0, %v2907_v14  ;;  %v4774_v0 = vld [vmem:[#allocation20_spill] sm:$0xff] }
 0x149   : > { %v2938_v49 = vunpack.i.h.bf16 %v2936_v63  ;;  %v2937_v27 = vunpack.i.l.bf16 %v2936_v63  ;;  %v713_v47 = vsel %vm473_vm7, %v712_v25, %v2932_v59  ;;  %v1182_v62 = vsel %vm473_vm7, %v1181_v51, %v2933_v54  ;;  %v4775_v54 = vld [vmem:[#allocation22_spill] sm:$0xff] }
 0x14a   : > { %v4428_v18 = vpop.permute.xlu1 %2940 }
 0x14b   : > { %v721_v40 = vsel %vm475_vm8, %v720_v23, %v2937_v27  ;;  %v1190_v46 = vsel %vm475_vm8, %v1189_v41, %v2938_v49  ;;  %v2912_v27 = vunpack.i.l.bf16 %v4404_v57  ;;  %v1644_v23 = vsel %vm463_vm2, %v4774_v0, %v2917_v11 }
 0x14c   : > { %v4432_v53 = vpop.permute.xlu0 %2945  ;;  %v2349_v60 = vrot.slane %v721_v40, 4  ;;  %v2355_v13 = vrot.slane %v1190_v46, 4  ;;  %v2927_v40 = vunpack.i.l.bf16 %v4422_v5  ;;  %v2943_v46 = vunpack.i.h.bf16 %v4428_v18 }
 0x14d   : > { %v2947_v2 = vunpack.i.l.bf16 %v4432_v53 }
 0x14e   : > { %v4434_v8 = vpop.permute.xlu1 %2950 }
 0x150   : > { %v4442_v34 = vpop.permute.xlu0 %2955 }
 0x151   : > { %v2958_v48 = vunpack.i.h.bf16 %v4442_v34  ;;  %v2957_v3 = vunpack.i.l.bf16 %v4442_v34  ;;  %v2928_v34 = vunpack.i.h.bf16 %v4422_v5 }
 0x152   : > { %v2961_v4 = vpop.permute.xlu1 %2960 }
 0x153   : > { %v2963_v1 = vunpack.i.h.bf16 %v2961_v4  ;;  %v2962_v63 = vunpack.i.l.bf16 %v2961_v4  ;;  %v472_v39 = vsel %vm471_vm6, %v4407_v17, %v2957_v3  ;;  %v2102_v59 = vsel %vm463_vm2, %v4775_v54, %v2928_v34 }
 0x154   : > { %v4448_v16 = vpop.permute.xlu0 %2965 }
 0x155   : > { %v482_v44 = vsel %vm473_vm7, %v481_v15, %v2962_v63  ;;  %v950_v9 = vsel %vm473_vm7, %v949_v45, %v2963_v1  ;;  %v2968_v21 = vunpack.i.h.bf16 %v4448_v16  ;;  %v2967_v49 = vunpack.i.l.bf16 %v4448_v16  ;;  %v4773_v1 = vld [vmem:[#allocation17_spill] sm:$0xff] }
 0x156   : > { %v4456_v33 = vpop.permute.xlu1 %2970  ;;  %v2109_v63 = vsel %vm463_vm2, %v4773_v1, %v2918_v10  ;;  %v4776_v10 = vld [vmem:[#allocation21_spill] sm:$0xff] }
 0x157   : > { %v714_v29 = vsel %vm475_vm8, %v713_v47, %v2967_v49  ;;  %v1183_v41 = vsel %vm475_vm8, %v1182_v62, %v2968_v21  ;;  %v1637_v11 = vsel %vm463_vm2, %v4776_v10, %v2927_v40  ;;  %v2972_v25 = vunpack.i.l.bf16 %v4456_v33 }
 0x158   : > { %v4462_v52 = vpop.permute.xlu0 %2975  ;;  %v1638_v3 = vsel %vm465_vm3, %v1637_v11, %v2947_v2 }
 0x159   : > { %v2977_v51 = vunpack.i.l.bf16 %v4462_v52 }
 0x15a   : > { %v4474_v61 = vpop.permute.xlu1 %2980 }
 0x15b   : > { %v2982_v47 = vunpack.i.l.bf16 %v4474_v61 }
 0x15c   : > { %v4482_v30 = vpop.permute.xlu0 %2985 }
 0x15e   : > { %v2991_v26 = vpop.permute.xlu1 %2990 }
 0x15f   : > { %v2993_v16 = vunpack.i.h.bf16 %v2991_v26  ;;  %v2992_v31 = vunpack.i.l.bf16 %v2991_v26  ;;  %v2942_v26 = vunpack.i.l.bf16 %v4428_v18  ;;  %v1645_v18 = vsel %vm465_vm3, %v1644_v23, %v2912_v27 }
 0x160   : > { %v2996_v55 = vpop.permute.xlu0 %2995 }
 0x161   : > { %v2998_v4 = vunpack.i.h.bf16 %v2996_v55  ;;  %v2997_v35 = vunpack.i.l.bf16 %v2996_v55  ;;  %v942_v55 = vsel %vm471_vm6, %v4410_v28, %v2958_v48  ;;  %v2948_v28 = vunpack.i.h.bf16 %v4432_v53 }
 0x162   : > { %v4496_v58 = vpop.permute.xlu1 %3000  ;;  %v1879_v53 = vsel %vm463_vm2, %v3915_v24, %v2943_v46  ;;  %v1414_v21 = vsel %vm463_vm2, %v3931_v56, %v2942_v26  ;;  %v2983_v24 = vunpack.i.h.bf16 %v4474_v61 }
 0x163   : > { %v483_v43 = vsel %vm475_vm8, %v482_v44, %v2997_v35  ;;  %v951_v37 = vsel %vm475_vm8, %v950_v9, %v2998_v4  ;;  %v2348_v4 = vrot.slane %v714_v29, 4  ;;  %v2354_v35 = vrot.slane %v1183_v41, 4 }
 0x164   : > { %v4506_v38 = vpop.permute.xlu0 %3005  ;;  %v2372_v42 = vsel %vm2370_vm9, %v483_v43, %v2349_v60  ;;  %v2374_v12 = vsel %vm2370_vm9, %v951_v37, %v2355_v13  ;;  %v474_v44 = vsel %vm473_vm7, %v472_v39, %v2992_v31  ;;  %v943_v9 = vsel %vm473_vm7, %v942_v55, %v2993_v16 }
 0x165   : > { %v2736_v20 = vpack.c.bf16 %v2374_v12, %v2372_v42  ;;  %v2913_v60 = vunpack.i.h.bf16 %v4404_v57  ;;  %v2953_v57 = vunpack.i.h.bf16 %v4434_v8  ;;  %v2952_v42 = vunpack.i.l.bf16 %v4434_v8 }
 0x166   : > { %v4515_v50 = vpop.permute.xlu1 %3010  ;;  %v2978_v8 = vunpack.i.h.bf16 %v4462_v52  ;;  %v2103_v48 = vsel %vm465_vm3, %v2102_v59, %v2948_v28  ;;  %v2987_v31 = vunpack.i.l.bf16 %v4482_v30  ;;  %v3003_v52 = vunpack.i.h.bf16 %v4496_v58 }
 0x167   : > { %2737 = vmatprep.subr.bf16.mxu0 %v2736_v20  ;;  %v2110_v12 = vsel %vm465_vm3, %v2109_v63, %v2913_v60  ;;  %v2973_v20 = vunpack.i.h.bf16 %v4456_v33  ;;  %v1646_v62 = vsel %vm467_vm4, %v1645_v18, %v2952_v42  ;;  %v2988_v33 = vunpack.i.h.bf16 %v4482_v30 }
 0x168   : > { %v4525_v22 = vpop.permute.xlu0 %3015  ;;  %v2111_v16 = vsel %vm467_vm4, %v2110_v12, %v2953_v57  ;;  %v3002_v1 = vunpack.i.l.bf16 %v4496_v58  ;;  %v3008_v63 = vunpack.i.h.bf16 %v4506_v38  ;;  %v3007_v0 = vunpack.i.l.bf16 %v4506_v38 }
 0x169   : > { %v1872_v61 = vsel %vm463_vm2, %v3991_v6, %v2973_v20  ;;  %v1407_v29 = vsel %vm463_vm2, %v3986_v19, %v2972_v25  ;;  %v1880_v41 = vsel %vm465_vm3, %v1879_v53, %v2978_v8  ;;  %v1415_v34 = vsel %vm465_vm3, %v1414_v21, %v2977_v51 }
 0x16a   : > { %v3021_v32 = vpop.permute.xlu1 %3020  ;;  %v1639_v30 = vsel %vm467_vm4, %v1638_v3, %v2982_v47  ;;  %v2104_v40 = vsel %vm467_vm4, %v2103_v48, %v2983_v24  ;;  %v3013_v58 = vunpack.i.h.bf16 %v4515_v50  ;;  %v3012_v46 = vunpack.i.l.bf16 %v4515_v50 }
 0x16b   : > { %v3023_v45 = vunpack.i.h.bf16 %v3021_v32  ;;  %v3022_v15 = vunpack.i.l.bf16 %v3021_v32  ;;  %v1647_v26 = vsel %vm469_vm5, %v1646_v62, %v2987_v31  ;;  %v2112_v6 = vsel %vm469_vm5, %v2111_v16, %v2988_v33 }
 0x16c   : > { %v4543_v5 = vpop.permute.xlu0 %3025  ;;  %v3018_v32 = vunpack.i.h.bf16 %v4525_v22  ;;  %v3017_v19 = vunpack.i.l.bf16 %v4525_v22  ;;  %v1408_v39 = vsel %vm465_vm3, %v1407_v29, %v3002_v1  ;;  %v1873_v55 = vsel %vm465_vm3, %v1872_v61, %v3003_v52 }
 0x16d   : > { %v476_v13 = vsel %vm475_vm8, %v474_v44, %v3022_v15  ;;  %v944_v17 = vsel %vm475_vm8, %v943_v9, %v3023_v45  ;;  %v1416_v45 = vsel %vm467_vm4, %v1415_v34, %v3007_v0  ;;  %v1881_v15 = vsel %vm467_vm4, %v1880_v41, %v3008_v63 }
 0x16e   : > { %v4551_v14 = vpop.permute.xlu1 %3030  ;;  %v2371_v43 = vsel %vm2370_vm9, %v476_v13, %v2348_v4  ;;  %v2373_v37 = vsel %vm2370_vm9, %v944_v17, %v2354_v35  ;;  %v3028_v50 = vunpack.i.h.bf16 %v4543_v5  ;;  %v3027_v35 = vunpack.i.l.bf16 %v4543_v5 }
 0x16f   : > { %v2738_v27 = vpack.c.bf16 %v2373_v37, %v2371_v43  ;;  %v3033_v44 = vunpack.i.h.bf16 %v4551_v14  ;;  %v3032_v9 = vunpack.i.l.bf16 %v4551_v14  ;;  %v1640_v60 = vsel %vm469_vm5, %v1639_v30, %v3012_v46 }
 0x170   : > { %v4566_v49 = vpop.permute.xlu0 %3035  ;;  %v2105_v22 = vsel %vm469_vm5, %v2104_v40, %v3013_v58  ;;  %v1648_v28 = vsel %vm471_vm6, %v1647_v26, %v3017_v19  ;;  %v2113_v2 = vsel %vm471_vm6, %v2112_v6, %v3018_v32  ;;  %v1874_v42 = vsel %vm467_vm4, %v1873_v55, %v3028_v50 }
 0x171   : > { %2739 = vmatpush1.bf16.msra.mxu0 %v2738_v27  ;;  %v3038_v18 = vunpack.i.h.bf16 %v4566_v49  ;;  %v3037_v13 = vunpack.i.l.bf16 %v4566_v49  ;;  %v1409_v12 = vsel %vm467_vm4, %v1408_v39, %v3027_v35  ;;  %v1417_v10 = vsel %vm469_vm5, %v1416_v45, %v3032_v9 }
 0x172   : > { %v3041_v56 = vpop.permute.xlu1 %3040  ;;  %v1882_v11 = vsel %vm469_vm5, %v1881_v15, %v3033_v44 }
 0x173   : > { %v3043_v43 = vunpack.i.h.bf16 %v3041_v56  ;;  %v3042_v37 = vunpack.i.l.bf16 %v3041_v56  ;;  %v1641_v53 = vsel %vm471_vm6, %v1640_v60, %v3037_v13  ;;  %v2106_v21 = vsel %vm471_vm6, %v2105_v22, %v3038_v18 }
 0x174   : > { %v3046_v23 = vpop.permute.xlu0 %3045 }
 0x175   : > { %v3048_v5 = vunpack.i.h.bf16 %v3046_v23  ;;  %v3047_v54 = vunpack.i.l.bf16 %v3046_v23  ;;  %v1649_v25 = vsel %vm473_vm7, %v1648_v28, %v3042_v37  ;;  %v2114_v8 = vsel %vm473_vm7, %v2113_v2, %v3043_v43 }
 0x176   : > { %v3051_v38 = vpop.permute.xlu1 %3050 }
 0x177   : > { %v3053_v51 = vunpack.i.h.bf16 %v3051_v38  ;;  %v3052_v48 = vunpack.i.l.bf16 %v3051_v38  ;;  %v1410_v3 = vsel %vm469_vm5, %v1409_v12, %v3047_v54  ;;  %v1875_v24 = vsel %vm469_vm5, %v1874_v42, %v3048_v5 }
 0x178   : > { %v3056_v4 = vpop.permute.xlu0 %3055 }
 0x179   : > { %v3058_v49 = vunpack.i.h.bf16 %v3056_v4  ;;  %v3057_v27 = vunpack.i.l.bf16 %v3056_v4  ;;  %v1418_v29 = vsel %vm471_vm6, %v1417_v10, %v3052_v48  ;;  %v1883_v41 = vsel %vm471_vm6, %v1882_v11, %v3053_v51 }
 0x17a   : > { %v3061_v17 = vpop.permute.xlu1 %3060 }
 0x17b   : > { %v3063_v59 = vunpack.i.h.bf16 %v3061_v17  ;;  %v3062_v57 = vunpack.i.l.bf16 %v3061_v17  ;;  %v1642_v1 = vsel %vm473_vm7, %v1641_v53, %v3057_v27  ;;  %v2107_v63 = vsel %vm473_vm7, %v2106_v21, %v3058_v49 }
 0x17c   : > { %v3066_v14 = vpop.permute.xlu0 %3065 }
 0x17d   : > { %v1650_v47 = vsel %vm475_vm8, %v1649_v25, %v3062_v57  ;;  %v2115_v56 = vsel %vm475_vm8, %v2114_v8, %v3063_v59  ;;  %v3068_v16 = vunpack.i.h.bf16 %v3066_v14  ;;  %v3067_v33 = vunpack.i.l.bf16 %v3066_v14 }
 0x17e   : > { %v3071_v20 = vpop.permute.xlu1 %3070  ;;  %v2361_v40 = vrot.slane %v1650_v47, 4  ;;  %v2367_v58 = vrot.slane %v2115_v56, 4 }
 0x17f   : > { %v3073_v0 = vunpack.i.h.bf16 %v3071_v20  ;;  %v3072_v23 = vunpack.i.l.bf16 %v3071_v20  ;;  %v1411_v6 = vsel %vm471_vm6, %v1410_v3, %v3067_v33  ;;  %v1876_v32 = vsel %vm471_vm6, %v1875_v24, %v3068_v16 }
 0x180   : > { %v3076_v62 = vpop.permute.xlu0 %3075 }
 0x181   : > { %v3078_v31 = vunpack.i.h.bf16 %v3076_v62  ;;  %v3077_v52 = vunpack.i.l.bf16 %v3076_v62  ;;  %v1419_v55 = vsel %vm473_vm7, %v1418_v29, %v3072_v23  ;;  %v1884_v45 = vsel %vm473_vm7, %v1883_v41, %v3073_v0  ;;  %v2499_v0 = vld [vmem:[%s4698_s3 + $0xf0] sm:$0xff]  ;;  %v2500_v23 = vld [vmem:[%s4698_s3 + $0xf8] sm:$0xff] }
 0x182   : > { %v3081_v61 = vpop.permute.xlu1 %3080  ;;  %v2483_v29 = vld [vmem:[%s4698_s3 + $0x70] sm:$0xff]  ;;  %v2484_v41 = vld [vmem:[%s4698_s3 + $0x78] sm:$0xff] }
 0x183   : > { %v1643_v34 = vsel %vm475_vm8, %v1642_v1, %v3077_v52  ;;  %v2108_v30 = vsel %vm475_vm8, %v2107_v63, %v3078_v31  ;;  %v3083_v46 = vunpack.i.h.bf16 %v3081_v61  ;;  %v3082_v38 = vunpack.i.l.bf16 %v3081_v61  ;;  %v2379_v1 = vld [vmem:[%s4696_s1] sm:$0xff] }
 0x184   : > { %v3086_v26 = vpop.permute.xlu0 %3085  ;;  %v2360_v15 = vrot.slane %v1643_v34, 4  ;;  %v2366_v4 = vrot.slane %v2108_v30, 4  ;;  %v2772_v61 = vpack.c.bf16 %v2500_v23, %v2499_v0  ;;  %v2774_v34 = vpack.c.bf16 %v2484_v41, %v2483_v29 }
 0x185   : > { %v3088_v19 = vunpack.i.h.bf16 %v3086_v26  ;;  %v3087_v39 = vunpack.i.l.bf16 %v3086_v26  ;;  %v1412_v22 = vsel %vm473_vm7, %v1411_v6, %v3082_v38  ;;  %v1877_v18 = vsel %vm473_vm7, %v1876_v32, %v3083_v46 }
 0x186   : > { %v3091_v50 = vpop.permute.xlu1 %3090  ;;  %2773 = vmatprep.subr.bf16.mxu1 %v2772_v61 }
 0x187   : > { %v1420_v35 = vsel %vm475_vm8, %v1419_v55, %v3087_v39  ;;  %v1885_v44 = vsel %vm475_vm8, %v1884_v45, %v3088_v19  ;;  %v3093_v9 = vunpack.i.h.bf16 %v3091_v50  ;;  %v3092_v60 = vunpack.i.l.bf16 %v3091_v50  ;;  %2775 = vmatpush3.bf16.msra.mxu1 %v2774_v34 }
 0x188   : > { %v2306_v13 = vpop.permute.xlu0 %2305  ;;  %v2376_v17 = vsel %vm2370_vm9, %v1420_v35, %v2361_v40  ;;  %v2378_v28 = vsel %vm2370_vm9, %v1885_v44, %v2367_v58 }
 0x189   : > { %v1413_v2 = vsel %vm475_vm8, %v1412_v22, %v3092_v60  ;;  %v1878_v43 = vsel %vm475_vm8, %v1877_v18, %v3093_v9  ;;  %v2740_v37 = vpack.c.bf16 %v2378_v28, %v2376_v17  ;;  %v2339_v27 = vsel %vm463_vm2, %v4213_v7, %v2306_v13 }
 0x18a   : > { %v2278_v5 = vpop.permute.xlu1 %2277  ;;  %v2375_v54 = vsel %vm2370_vm9, %v1413_v2, %v2360_v15  ;;  %v2377_v59 = vsel %vm2370_vm9, %v1878_v43, %v2366_v4 }
 0x18b   : > { %2741 = vmatprep.subr.bf16.mxu0 %v2740_v37  ;;  %v2742_v57 = vpack.c.bf16 %v2377_v59, %v2375_v54  ;;  %v2332_v8 = vsel %vm463_vm2, %v4217_v36, %v2278_v5 }
 0x18c   : > { %v2310_v14 = vpop.permute.xlu0 %2309 }
 0x18d   : > { %2743 = vmatpush1.bf16.msra.mxu0 %v2742_v57  ;;  %v2340_v20 = vsel %vm465_vm3, %v2339_v27, %v2310_v14 }
 0x18e   : > { %v2282_v42 = vpop.permute.xlu1 %2281 }
 0x18f   : > { %v2333_v48 = vsel %vm465_vm3, %v2332_v8, %v2282_v42 }
 0x190   : > { %v2314_v12 = vpop.permute.xlu0 %2313 }
 0x191   : > { %v2341_v51 = vsel %vm467_vm4, %v2340_v20, %v2314_v12 }
 0x192   : > { %v2286_v10 = vpop.permute.xlu1 %2285 }
 0x193   : > { %v2334_v47 = vsel %vm467_vm4, %v2333_v48, %v2286_v10 }
 0x194   : > { %v2318_v11 = vpop.permute.xlu0 %2317 }
 0x195   : > { %v2342_v3 = vsel %vm469_vm5, %v2341_v51, %v2318_v11 }
 0x196   : > { %v2290_v53 = vpop.permute.xlu1 %2289 }
 0x197   : > { %v2335_v62 = vsel %vm469_vm5, %v2334_v47, %v2290_v53 }
 0x198   : > { %v2322_v21 = vpop.permute.xlu0 %2321 }
 0x199   : > { %v2343_v56 = vsel %vm471_vm6, %v2342_v3, %v2322_v21 }
 0x19a   : > { %v2294_v49 = vpop.permute.xlu1 %2293 }
 0x19b   : > { %v2336_v33 = vsel %vm471_vm6, %v2335_v62, %v2294_v49 }
 0x19c   : > { %v2326_v25 = vpop.permute.xlu0 %2325 }
 0x19d   : > { %v2344_v7 = vsel %vm473_vm7, %v2343_v56, %v2326_v25 }
 0x19e   : > { %v2298_v24 = vpop.permute.xlu1 %2297 }
 0x19f   : > { %v2337_v31 = vsel %vm473_vm7, %v2336_v33, %v2298_v24 }
 0x1a0   : > { %v2330_v16 = vpop.permute.xlu0 %2329 }
 0x1a1   : > { %v2345_v36 = vsel %vm475_vm8, %v2344_v7, %v2330_v16 }
 0x1a2   : > { %v2302_v52 = vpop.permute.xlu1 %2301  ;;  %2695 = vmatprep.subr.msk.mxu0 %vm2370_vm9, %v2345_v36 }
 0x1a3   : > { %v2338_v63 = vsel %vm475_vm8, %v2337_v31, %v2302_v52 }
 0x1a4   : > { %2696 = vmatpush1.msk.msra.mxu0 %vm2370_vm9, %v2338_v63 }
 0x1a5   : > { %2697 = vmatmul.mubr.msk.f32.vlgmr.msra.gmra.mrb[0].mxu0 %vm2386_vm10, %v2379_v1 }
 0x1b1   : > { %v2384_v30 = vpop.permute.xlu0 %2383 }
 0x278   : > { %v2462_v40 = vpop.f32.mrb[0].mxu0 }
 0x279   : > { %v2463_v58 = vadd.f32 %v2462_v40, %v2384_v30  ;;  %v2464_v46 = vpop.f32.mrb[1].mxu0 }
 0x27a   : > { %v2465_v38 = vadd.f32 %v2464_v46, %v2384_v30 }
 0x27b   : > { %v2467_v26 = vmax.f32 %v2463_v58, 0.0 }
 0x27c   : > { %v2468_v6 = vmax.f32 %v2465_v38, 0.0 }
 0x27d   : > { %2501 = vst [vmem:[%s253_s24] sm:$0xff] %v2467_v26 }
 0x27e   : > { %2502 = vst [vmem:[%s253_s24 + $0x8] sm:$0xff] %v2468_v6  ;;  %2567 = vmatprep.mubr.f32.mxu1 %v2468_v6 }
 0x27f   : > { %2568 = vmatmul.mubr.f32.vlgmr.msra.gmra.mrb[0].mxu1 %v2467_v26 }
 0x352   : > { %v2733_v32 = vpop.f32.mrb[0].mxu1 }
 0x353   : > { %v2734_v19 = vpop.f32.mrb[1].mxu1 }
 0x354   : > { %v2735_v39 = vadd.f32 %v2734_v19, %v2733_v32 }
 0x356   : > { %2573 = vst.msk [vmem:[%s258_s7] sm:$0xff] %vm463_vm2, %v2735_v39 }
 0x357 PF: > { %s16_s20 = sadd.s32 1, %s3125_s20   ;;  %s4777_s18 = smov %s3121_s19 }
 0x358   : > { %p13_p5 = scmp.ge.s32.totalorder %s16_s20, 4   ;;  %s4778_s19 = smov %s4780_s21 }
 0x35a   :  { %15 = sbr.rel (!%p13_p5) target bundleno = 2 (0x2), region = 78 }

</bundles_post_ra>
